<compile_context>
chip_gen: v7x
topology: tpu7x:2x2x1
jax: 0.10.0
libtpu: 0.0.40
codegen_flags: <defaults>
</compile_context>

<pallas_src>
import numpy as np
import jax
import jax.numpy as jnp
from jax.experimental import pallas as pl
from jax.experimental.pallas import tpu as pltpu


# ----------------------------------------------------------------------------
# Fused MAGNN_lp_layer kernel: intra-metapath attention + inter-metapath
# attention + fc_user, one grid step per graph.
# ----------------------------------------------------------------------------
def _fused_magnn_kernel(inst_ref, tgt_ref, mask_ref, a1_ref, a2_ref,
                        w1_ref, b1_ref, w2_ref, fcw_ref, fcb_ref,
                        h_ref, logits_ref, beta_ref, mouts_sc):
    # inst_ref : (1, P, N, K, H*D)  mean-over-L encoded metapath instances
    # tgt_ref  : (1, P, N, H*D)     target-node features
    # mask_ref : (1, P, N, K)       1.0 = real instance, 0.0 = padding
    # a1_ref   : (P, H, D)          attention vector, target part
    # a2_ref   : (P, H, D)          attention vector, instance part
    # w1/b1    : (H*D, A) / (1, A)  inter-metapath attention fc1
    # w2       : (A, 1)             inter-metapath attention fc2 (no bias)
    # fcw/fcb  : (H*D, O) / (1, O)  fc_user
    # h_ref    : (1, N, H*D)   logits_ref : (1, N, O)   beta_ref : (1, 1, P)
    # mouts_sc : VMEM scratch (P*N, H*D) — lane-dense per-metapath embeddings.
    P = inst_ref.shape[1]
    N = inst_ref.shape[2]
    H = a1_ref.shape[1]
    D = a1_ref.shape[2]

    # ---- intra-metapath instance attention ---------------------------------
    # P and H are tiny static constants; each head works on a disjoint D-wide
    # aspect lane slice, so the head loop is unrolled (features are loaded once
    # per metapath and shared by all heads).
    for p in range(P):
        x_all = inst_ref[0, p]                       # (N, K, H*D)
        t_all = tgt_ref[0, p]                        # (N, H*D)
        valid = mask_ref[0, p] > 0.5                 # (N, K)
        a1p = a1_ref[p]                              # (H, D)
        a2p = a2_ref[p]                              # (H, D)
        for h in range(H):
            lo = h * D
            x = x_all[:, :, lo:lo + D]               # (N, K, D) aspect slice
            t = t_all[:, lo:lo + D]                  # (N, D)
            e1 = jnp.sum(t * a1p[h:h + 1], axis=-1, keepdims=True)   # (N, 1)
            e2 = jnp.sum(x * a2p[h:h + 1], axis=-1)                  # (N, K)
            e = e1 + e2
            e = jnp.where(e >= 0.0, e, 0.2 * e)                      # LeakyReLU(0.2)
            e = jnp.where(valid, e, -1e30)                           # mask padded instances
            e = e - jnp.max(e, axis=-1, keepdims=True)
            w = jnp.where(valid, jnp.exp(e), 0.0)
            inv = pl.reciprocal(jnp.sum(w, axis=-1, keepdims=True), approx=True)
            alpha = w * inv                                          # softmax over K instances
            # K is tiny: broadcast-multiply + sublane reduce beats an MXU pass here.
            agg = jnp.sum(alpha[:, :, None] * x, axis=1)             # (N, D)
            agg = jnp.where(agg > 0.0, agg, jnp.exp(agg) - 1.0)      # ELU
            # assemble the lane-dense (N, H*D) metapath embedding in VMEM
            mouts_sc[p * N:(p + 1) * N, lo:lo + D] = agg

    mouts = mouts_sc[...]                                            # (P*N, H*D)

    # ---- inter-metapath attention: single batched fc1 matmul over all P*N
    # rows (bf16 operands, f32 accumulate), per-metapath mean + fc2 score. ----
    f1 = jnp.tanh(
        jnp.dot(mouts.astype(jnp.bfloat16), w1_ref[...].astype(jnp.bfloat16),
                preferred_element_type=jnp.float32) + b1_ref[...])   # (P*N, A)
    scores = []
    for p in range(P):
        f1p = jnp.mean(f1[p * N:(p + 1) * N, :], axis=0, keepdims=True)            # (1, A)
        scores.append(jnp.dot(f1p, w2_ref[...], preferred_element_type=jnp.float32))  # (1, 1)

    # softmax over the tiny static metapath axis (no concat / transpose needed)
    s_max = scores[0]
    for p in range(1, P):
        s_max = jnp.maximum(s_max, scores[p])
    exs = [jnp.exp(sp - s_max) for sp in scores]
    denom = exs[0]
    for p in range(1, P):
        denom = denom + exs[p]
    inv = pl.reciprocal(denom, approx=True)
    betas = [ex * inv for ex in exs]                                 # list of (1, 1)

    # ---- weighted metapath fusion + fused fc_user projection ----------------
    h_user = betas[0] * mouts[0:N, :]
    for p in range(1, P):
        h_user = h_user + betas[p] * mouts[p * N:(p + 1) * N, :]     # (N, H*D)
    logits = jnp.dot(h_user.astype(jnp.bfloat16), fcw_ref[...].astype(jnp.bfloat16),
                     preferred_element_type=jnp.float32) + fcb_ref[...]             # (N, O)

    h_ref[0] = h_user
    logits_ref[0] = logits
    for p in range(P):
        beta_ref[0, :, p:p + 1] = betas[p]


def magnn_lp_layer_forward(asp_features, edge_indices, target_idx, inst_mask, params):
    """MAGNN_lp_layer.forward over all G graphs in one fused pallas_call.

    asp_features : (num_nodes, H*D) f32 node features
    edge_indices : (G, P, N, K, L) int32 metapath-instance node ids
    target_idx   : (G, P, N)       int32 target node ids
    inst_mask    : (G, P, N, K)    f32, 1.0 for real instances (>=1 per target)
    """
    a1, a2, w1, b1, w2, fcw, fcb = params
    G, P, N, K, _L = edge_indices.shape
    H, D = a1.shape[1], a1.shape[2]
    HD = H * D
    A = w1.shape[1]
    O = fcw.shape[1]

    # Gather + metapath-instance encoding (mean over L) stay in XLA glue so the
    # kernel never sees the L axis.
    inst_feat = jnp.mean(asp_features[edge_indices], axis=4)         # (G, P, N, K, HD)
    tgt_feat = asp_features[target_idx]                              # (G, P, N, HD)

    h_all, logits_all, beta_all = pl.pallas_call(
        _fused_magnn_kernel,
        out_shape=(
            jax.ShapeDtypeStruct((G, N, HD), jnp.float32),   # h_user
            jax.ShapeDtypeStruct((G, N, O), jnp.float32),    # logits_user
            jax.ShapeDtypeStruct((G, 1, P), jnp.float32),    # inter-metapath attention (lane-dense)
        ),
        grid=(G,),
        in_specs=[
            pl.BlockSpec((1, P, N, K, HD), lambda g: (g, 0, 0, 0, 0)),
            pl.BlockSpec((1, P, N, HD), lambda g: (g, 0, 0, 0)),
            pl.BlockSpec((1, P, N, K), lambda g: (g, 0, 0, 0)),
            pl.BlockSpec((P, H, D), lambda g: (0, 0, 0)),
            pl.BlockSpec((P, H, D), lambda g: (0, 0, 0)),
            pl.BlockSpec((HD, A), lambda g: (0, 0)),
            pl.BlockSpec((1, A), lambda g: (0, 0)),
            pl.BlockSpec((A, 1), lambda g: (0, 0)),
            pl.BlockSpec((HD, O), lambda g: (0, 0)),
            pl.BlockSpec((1, O), lambda g: (0, 0)),
        ],
        out_specs=(
            pl.BlockSpec((1, N, HD), lambda g: (g, 0, 0)),
            pl.BlockSpec((1, N, O), lambda g: (g, 0, 0)),
            pl.BlockSpec((1, 1, P), lambda g: (g, 0, 0)),
        ),
        scratch_shapes=[pltpu.VMEM((P * N, HD), jnp.float32)],
        compiler_params=pltpu.CompilerParams(
            dimension_semantics=("parallel",)),   # graphs shard across TCs on v7x
    )(inst_feat, tgt_feat, inst_mask, a1, a2, w1, b1, w2, fcw, fcb)

    h_list = [h_all[g] for g in range(G)]
    logits_list = [logits_all[g] for g in range(G)]
    att_list = [beta_all[g, 0][:, None] for g in range(G)]          # (P, 1) per graph
    return h_list, logits_list, att_list


# ----------------------------------------------------------------------------
# DHGNN_lp.forward (eval mode: all dropout = identity).  The per-node-type
# input projections and the `cores` alignment scores are tiny dense matmuls
# left to XLA glue; the hot MAGNN layer runs in the fused Pallas kernel.
# ----------------------------------------------------------------------------
def dhgnn_lp_forward(features_list, type_mask, edge_indices, target_idx, inst_mask, params):
    fc_ws, fc_bs, cores_w, layer_params = params
    a1 = layer_params[0]
    num_heads, asp_dim = a1.shape[1], a1.shape[2]
    dim = num_heads * asp_dim
    num_nodes = type_mask.shape[0]

    transformed = jnp.zeros((num_nodes, dim), jnp.float32)
    for i, (w, b) in enumerate(zip(fc_ws, fc_bs)):
        node_idx = np.where(type_mask == i)[0]                       # static indices
        transformed = transformed.at[node_idx].set(features_list[i] @ w + b[None, :])
    # feat_drop (eval) and the view(-1, asp_dim) -> view(-1, dim) round-trip are identity.
    asp_features = transformed

    h_list, logits_list, att_list = magnn_lp_layer_forward(
        asp_features, edge_indices, target_idx, inst_mask, layer_params)

    # align_score: cores(mean(h, 0)) with h viewed as (N, num_heads, asp_dim)
    align_score = [jnp.mean(h.reshape(-1, num_heads, asp_dim), axis=0) @ cores_w.T
                   for h in h_list]
    return h_list, logits_list, asp_features, align_score, att_list


def _xavier_normal(key, shape, gain=1.414):
    fan_in, fan_out = shape[-2], shape[-1]
    std = gain * (2.0 / (fan_in + fan_out)) ** 0.5
    return std * jax.random.normal(key, shape, jnp.float32)


def _xavier_uniform(key, shape, gain=1.414):
    fan_out, fan_in = shape[-2], shape[-1]        # torch Linear weight layout (out, in)
    bound = gain * (6.0 / (fan_in + fan_out)) ** 0.5
    return jax.random.uniform(key, shape, jnp.float32, -bound, bound)


if __name__ == "__main__":
    # Small deterministic synthetic problem (eval-mode forward).
    feats_dim_list = [10, 12]        # raw feature dims per node type
    asp_dim = 32                     # D  (MAGNN layer in_dim)
    num_heads = 2                    # H
    dim = num_heads * asp_dim        # 64
    out_dim = 16
    attn_vec_dim = 32                # A
    num_metapaths = 2                # P
    num_graphs = 2                   # G (length of the g_lists handed to MAGNN_lp_layer)
    num_targets = 8                  # N
    insts_per_target = 4             # K
    metapath_len = 3                 # L
    nodes_per_type = 12
    num_nodes = nodes_per_type * len(feats_dim_list)

    key = jax.random.PRNGKey(0)
    ks = jax.random.split(key, 16)

    type_mask = np.repeat(np.arange(len(feats_dim_list)), nodes_per_type)
    features_list = [jax.random.normal(ks[i], (nodes_per_type, feats_dim_list[i]), jnp.float32)
                     for i in range(len(feats_dim_list))]

    edge_indices = jax.random.randint(
        ks[2], (num_graphs, num_metapaths, num_targets, insts_per_target, metapath_len),
        0, num_nodes, jnp.int32)
    target_idx = jax.random.randint(
        ks[3], (num_graphs, num_metapaths, num_targets), 0, num_nodes, jnp.int32)
    inst_mask = (jax.random.uniform(
        ks[4], (num_graphs, num_metapaths, num_targets, insts_per_target)) > 0.25)
    inst_mask = inst_mask.at[..., 0].set(True).astype(jnp.float32)   # >=1 valid instance per target

    # DHGNN_lp parameters.
    fc_ws, fc_bs = [], []
    for i, fd in enumerate(feats_dim_list):
        stdv = 1.0 / np.sqrt(fd)
        fc_ws.append(jax.random.uniform(ks[5 + i], (fd, dim), jnp.float32, -stdv, stdv))
        fc_bs.append(jax.random.uniform(ks[7 + i], (dim,), jnp.float32, -stdv, stdv))
    cores_w = _xavier_uniform(ks[9], (num_heads, asp_dim))            # Linear(asp_dim, num_heads, bias=False)

    # MAGNN_lp_layer parameters (shared across graphs).
    a1 = 0.1 * jax.random.normal(ks[10], (num_metapaths, num_heads, asp_dim), jnp.float32)
    a2 = 0.1 * jax.random.normal(ks[11], (num_metapaths, num_heads, asp_dim), jnp.float32)
    w1 = _xavier_normal(ks[12], (dim, attn_vec_dim))                  # inter-attention fc1
    b1 = jnp.zeros((1, attn_vec_dim), jnp.float32)
    w2 = _xavier_normal(ks[13], (attn_vec_dim, 1))                    # inter-attention fc2 (no bias)
    fcw = _xavier_normal(ks[14], (dim, out_dim))                      # fc_user
    fcb = jnp.zeros((1, out_dim), jnp.float32)
    layer_params = (a1, a2, w1, b1, w2, fcw, fcb)
    params = (fc_ws, fc_bs, cores_w, layer_params)

    h_list, logits_list, asp_features, align_score, att_list = dhgnn_lp_forward(
        features_list, type_mask, edge_indices, target_idx, inst_mask, params)
    jax.block_until_ready((h_list, logits_list, asp_features, align_score, att_list))

    assert asp_features.shape == (num_nodes, dim)
    assert all(h.shape == (num_targets, dim) for h in h_list)
    assert all(l.shape == (num_targets, out_dim) for l in logits_list)
    assert all(a.shape == (num_heads, num_heads) for a in align_score)
    assert all(b.shape == (num_metapaths, 1) for b in att_list)
    flat = h_list + logits_list + [asp_features] + align_score + att_list
    assert all(bool(jnp.all(jnp.isfinite(x))) for x in flat)
    print("KERNEL_OK")
</pallas_src>

<mosaic_0001>
module attributes {stable_mosaic.version = 11 : i64} {
  func.func @_fused_magnn_kernel(%arg0: i32, %arg1: memref<1x2x8x4x64xf32, #tpu.memory_space<vmem>>, %arg2: memref<1x2x8x64xf32, #tpu.memory_space<vmem>>, %arg3: memref<1x2x8x4xf32, #tpu.memory_space<vmem>>, %arg4: memref<2x2x32xf32, #tpu.memory_space<vmem>>, %arg5: memref<2x2x32xf32, #tpu.memory_space<vmem>>, %arg6: memref<64x32xf32, #tpu.memory_space<vmem>>, %arg7: memref<1x32xf32, #tpu.memory_space<vmem>>, %arg8: memref<32x1xf32, #tpu.memory_space<vmem>>, %arg9: memref<64x16xf32, #tpu.memory_space<vmem>>, %arg10: memref<1x16xf32, #tpu.memory_space<vmem>>, %arg11: memref<1x8x64xf32, #tpu.memory_space<vmem>>, %arg12: memref<1x8x16xf32, #tpu.memory_space<vmem>>, %arg13: memref<1x1x2xf32, #tpu.memory_space<vmem>>, %arg14: memref<16x64xf32, #tpu.memory_space<vmem>>) attributes {dimension_semantics = [#tpu.dimension_semantics<parallel>], iteration_bounds = array<i64: 2>, scalar_prefetch = 0 : i64, scratch_operands = 1 : i64, tpu.core_type = #tpu.core_type<tc>, window_params = [{transform_indices = @transform_0, window_bounds = array<i64: 1, 2, 8, 4, 64>}, {transform_indices = @transform_1, window_bounds = array<i64: 1, 2, 8, 64>}, {transform_indices = @transform_2, window_bounds = array<i64: 1, 2, 8, 4>}, {pipeline_mode = #tpu.pipeline_mode<synchronous>, transform_indices = @transform_3, window_bounds = array<i64: 2, 2, 32>}, {pipeline_mode = #tpu.pipeline_mode<synchronous>, transform_indices = @transform_4, window_bounds = array<i64: 2, 2, 32>}, {pipeline_mode = #tpu.pipeline_mode<synchronous>, transform_indices = @transform_5, window_bounds = array<i64: 64, 32>}, {pipeline_mode = #tpu.pipeline_mode<synchronous>, transform_indices = @transform_6, window_bounds = array<i64: 1, 32>}, {pipeline_mode = #tpu.pipeline_mode<synchronous>, transform_indices = @transform_7, window_bounds = array<i64: 32, 1>}, {pipeline_mode = #tpu.pipeline_mode<synchronous>, transform_indices = @transform_8, window_bounds = array<i64: 64, 16>}, {pipeline_mode = #tpu.pipeline_mode<synchronous>, transform_indices = @transform_9, window_bounds = array<i64: 1, 16>}, {transform_indices = @transform_10, window_bounds = array<i64: 1, 8, 64>}, {transform_indices = @transform_11, window_bounds = array<i64: 1, 8, 16>}, {transform_indices = @transform_12, window_bounds = array<i64: 1, 1, 2>}]} {
    %c0 = arith.constant 0 : index
    %c0_0 = arith.constant 0 : index
    %c0_1 = arith.constant 0 : index
    %c0_2 = arith.constant 0 : index
    %c0_3 = arith.constant 0 : index
    %0 = vector.load %arg1[%c0, %c0_0, %c0_1, %c0_2, %c0_3] : memref<1x2x8x4x64xf32, #tpu.memory_space<vmem>>, vector<1x1x8x4x64xf32>
    %1 = vector.shape_cast %0 : vector<1x1x8x4x64xf32> to vector<8x4x64xf32>
    %c0_4 = arith.constant 0 : index
    %c0_5 = arith.constant 0 : index
    %c0_6 = arith.constant 0 : index
    %c0_7 = arith.constant 0 : index
    %2 = vector.load %arg2[%c0_4, %c0_5, %c0_6, %c0_7] : memref<1x2x8x64xf32, #tpu.memory_space<vmem>>, vector<1x1x8x64xf32>
    %3 = vector.shape_cast %2 : vector<1x1x8x64xf32> to vector<8x64xf32>
    %c0_8 = arith.constant 0 : index
    %c0_9 = arith.constant 0 : index
    %c0_10 = arith.constant 0 : index
    %c0_11 = arith.constant 0 : index
    %4 = vector.load %arg3[%c0_8, %c0_9, %c0_10, %c0_11] : memref<1x2x8x4xf32, #tpu.memory_space<vmem>>, vector<1x1x8x4xf32>
    %5 = vector.shape_cast %4 : vector<1x1x8x4xf32> to vector<8x4xf32>
    %cst = arith.constant 5.000000e-01 : f32
    %6 = vector.broadcast %cst : f32 to vector<8x4xf32>
    %7 = arith.cmpf ogt, %5, %6 : vector<8x4xf32>
    %c0_12 = arith.constant 0 : index
    %c0_13 = arith.constant 0 : index
    %c0_14 = arith.constant 0 : index
    %8 = vector.load %arg4[%c0_12, %c0_13, %c0_14] : memref<2x2x32xf32, #tpu.memory_space<vmem>>, vector<1x2x32xf32>
    %9 = vector.shape_cast %8 : vector<1x2x32xf32> to vector<2x32xf32>
    %c0_15 = arith.constant 0 : index
    %c0_16 = arith.constant 0 : index
    %c0_17 = arith.constant 0 : index
    %10 = vector.load %arg5[%c0_15, %c0_16, %c0_17] : memref<2x2x32xf32, #tpu.memory_space<vmem>>, vector<1x2x32xf32>
    %11 = vector.shape_cast %10 : vector<1x2x32xf32> to vector<2x32xf32>
    %12 = vector.extract_strided_slice %1 {offsets = [0, 0, 0], sizes = [8, 4, 32], strides = [1, 1, 1]} : vector<8x4x64xf32> to vector<8x4x32xf32>
    %13 = vector.extract_strided_slice %3 {offsets = [0, 0], sizes = [8, 32], strides = [1, 1]} : vector<8x64xf32> to vector<8x32xf32>
    %14 = vector.extract_strided_slice %9 {offsets = [0, 0], sizes = [1, 32], strides = [1, 1]} : vector<2x32xf32> to vector<1x32xf32>
    %15 = vector.broadcast %14 : vector<1x32xf32> to vector<8x32xf32>
    %16 = arith.mulf %13, %15 : vector<8x32xf32>
    %cst_18 = arith.constant dense<0.000000e+00> : vector<8xf32>
    %17 = vector.multi_reduction <add>, %16, %cst_18 [1] : vector<8x32xf32> to vector<8xf32>
    %18 = vector.shape_cast %17 : vector<8xf32> to vector<8x1xf32>
    %19 = vector.extract_strided_slice %11 {offsets = [0, 0], sizes = [1, 32], strides = [1, 1]} : vector<2x32xf32> to vector<1x32xf32>
    %20 = vector.shape_cast %19 : vector<1x32xf32> to vector<1x1x32xf32>
    %21 = vector.broadcast %20 : vector<1x1x32xf32> to vector<8x4x32xf32>
    %22 = arith.mulf %12, %21 : vector<8x4x32xf32>
    %cst_19 = arith.constant dense<0.000000e+00> : vector<8x4xf32>
    %23 = vector.multi_reduction <add>, %22, %cst_19 [2] : vector<8x4x32xf32> to vector<8x4xf32>
    %24 = vector.broadcast %18 : vector<8x1xf32> to vector<8x4xf32>
    %25 = arith.addf %24, %23 : vector<8x4xf32>
    %cst_20 = arith.constant 0.000000e+00 : f32
    %26 = vector.broadcast %cst_20 : f32 to vector<8x4xf32>
    %27 = arith.cmpf oge, %25, %26 : vector<8x4xf32>
    %cst_21 = arith.constant 2.000000e-01 : f32
    %28 = vector.broadcast %cst_21 : f32 to vector<8x4xf32>
    %29 = arith.mulf %28, %25 : vector<8x4xf32>
    %30 = arith.select %27, %25, %29 : vector<8x4xi1>, vector<8x4xf32>
    %cst_22 = arith.constant -1.000000e+30 : f32
    %31 = vector.broadcast %cst_22 : f32 to vector<8x4xf32>
    %32 = arith.select %7, %30, %31 : vector<8x4xi1>, vector<8x4xf32>
    %cst_23 = arith.constant dense<0xFF800000> : vector<8xf32>
    %33 = vector.multi_reduction <maximumf>, %32, %cst_23 [1] : vector<8x4xf32> to vector<8xf32>
    %34 = vector.shape_cast %33 : vector<8xf32> to vector<8x1xf32>
    %35 = vector.broadcast %34 : vector<8x1xf32> to vector<8x4xf32>
    %36 = arith.subf %32, %35 : vector<8x4xf32>
    %37 = math.exp %36 : vector<8x4xf32>
    %cst_24 = arith.constant 0.000000e+00 : f32
    %38 = vector.broadcast %cst_24 : f32 to vector<8x4xf32>
    %39 = arith.select %7, %37, %38 : vector<8x4xi1>, vector<8x4xf32>
    %cst_25 = arith.constant dense<0.000000e+00> : vector<8xf32>
    %40 = vector.multi_reduction <add>, %39, %cst_25 [1] : vector<8x4xf32> to vector<8xf32>
    %41 = vector.shape_cast %40 : vector<8xf32> to vector<8x1xf32>
    %42 = tpu.reciprocal %41 {approx = true} : vector<8x1xf32> -> vector<8x1xf32>
    %43 = vector.broadcast %42 : vector<8x1xf32> to vector<8x4xf32>
    %44 = arith.mulf %39, %43 : vector<8x4xf32>
    %45 = vector.shape_cast %44 : vector<8x4xf32> to vector<8x4x1xf32>
    %46 = vector.broadcast %45 : vector<8x4x1xf32> to vector<8x4x32xf32>
    %47 = arith.mulf %46, %12 : vector<8x4x32xf32>
    %cst_26 = arith.constant dense<0.000000e+00> : vector<8x32xf32>
    %48 = vector.multi_reduction <add>, %47, %cst_26 [1] : vector<8x4x32xf32> to vector<8x32xf32>
    %cst_27 = arith.constant 0.000000e+00 : f32
    %49 = vector.broadcast %cst_27 : f32 to vector<8x32xf32>
    %50 = arith.cmpf ogt, %48, %49 : vector<8x32xf32>
    %51 = math.exp %48 : vector<8x32xf32>
    %cst_28 = arith.constant 1.000000e+00 : f32
    %52 = vector.broadcast %cst_28 : f32 to vector<8x32xf32>
    %53 = arith.subf %51, %52 : vector<8x32xf32>
    %54 = arith.select %50, %48, %53 : vector<8x32xi1>, vector<8x32xf32>
    %c0_29 = arith.constant 0 : index
    %c0_30 = arith.constant 0 : index
    %55 = vector.load %arg14[%c0_29, %c0_30] : memref<16x64xf32, #tpu.memory_space<vmem>>, vector<8x32xf32>
    tpu.vector_store %arg14[%c0_29, %c0_30], %54 {strides = array<i32>} : memref<16x64xf32, #tpu.memory_space<vmem>>, vector<8x32xf32>,
    %56 = vector.extract_strided_slice %1 {offsets = [0, 0, 32], sizes = [8, 4, 32], strides = [1, 1, 1]} : vector<8x4x64xf32> to vector<8x4x32xf32>
    %57 = vector.extract_strided_slice %3 {offsets = [0, 32], sizes = [8, 32], strides = [1, 1]} : vector<8x64xf32> to vector<8x32xf32>
    %58 = vector.extract_strided_slice %9 {offsets = [1, 0], sizes = [1, 32], strides = [1, 1]} : vector<2x32xf32> to vector<1x32xf32>
    %59 = vector.broadcast %58 : vector<1x32xf32> to vector<8x32xf32>
    %60 = arith.mulf %57, %59 : vector<8x32xf32>
    %cst_31 = arith.constant dense<0.000000e+00> : vector<8xf32>
    %61 = vector.multi_reduction <add>, %60, %cst_31 [1] : vector<8x32xf32> to vector<8xf32>
    %62 = vector.shape_cast %61 : vector<8xf32> to vector<8x1xf32>
    %63 = vector.extract_strided_slice %11 {offsets = [1, 0], sizes = [1, 32], strides = [1, 1]} : vector<2x32xf32> to vector<1x32xf32>
    %64 = vector.shape_cast %63 : vector<1x32xf32> to vector<1x1x32xf32>
    %65 = vector.broadcast %64 : vector<1x1x32xf32> to vector<8x4x32xf32>
    %66 = arith.mulf %56, %65 : vector<8x4x32xf32>
    %cst_32 = arith.constant dense<0.000000e+00> : vector<8x4xf32>
    %67 = vector.multi_reduction <add>, %66, %cst_32 [2] : vector<8x4x32xf32> to vector<8x4xf32>
    %68 = vector.broadcast %62 : vector<8x1xf32> to vector<8x4xf32>
    %69 = arith.addf %68, %67 : vector<8x4xf32>
    %cst_33 = arith.constant 0.000000e+00 : f32
    %70 = vector.broadcast %cst_33 : f32 to vector<8x4xf32>
    %71 = arith.cmpf oge, %69, %70 : vector<8x4xf32>
    %cst_34 = arith.constant 2.000000e-01 : f32
    %72 = vector.broadcast %cst_34 : f32 to vector<8x4xf32>
    %73 = arith.mulf %72, %69 : vector<8x4xf32>
    %74 = arith.select %71, %69, %73 : vector<8x4xi1>, vector<8x4xf32>
    %cst_35 = arith.constant -1.000000e+30 : f32
    %75 = vector.broadcast %cst_35 : f32 to vector<8x4xf32>
    %76 = arith.select %7, %74, %75 : vector<8x4xi1>, vector<8x4xf32>
    %cst_36 = arith.constant dense<0xFF800000> : vector<8xf32>
    %77 = vector.multi_reduction <maximumf>, %76, %cst_36 [1] : vector<8x4xf32> to vector<8xf32>
    %78 = vector.shape_cast %77 : vector<8xf32> to vector<8x1xf32>
    %79 = vector.broadcast %78 : vector<8x1xf32> to vector<8x4xf32>
    %80 = arith.subf %76, %79 : vector<8x4xf32>
    %81 = math.exp %80 : vector<8x4xf32>
    %cst_37 = arith.constant 0.000000e+00 : f32
    %82 = vector.broadcast %cst_37 : f32 to vector<8x4xf32>
    %83 = arith.select %7, %81, %82 : vector<8x4xi1>, vector<8x4xf32>
    %cst_38 = arith.constant dense<0.000000e+00> : vector<8xf32>
    %84 = vector.multi_reduction <add>, %83, %cst_38 [1] : vector<8x4xf32> to vector<8xf32>
    %85 = vector.shape_cast %84 : vector<8xf32> to vector<8x1xf32>
    %86 = tpu.reciprocal %85 {approx = true} : vector<8x1xf32> -> vector<8x1xf32>
    %87 = vector.broadcast %86 : vector<8x1xf32> to vector<8x4xf32>
    %88 = arith.mulf %83, %87 : vector<8x4xf32>
    %89 = vector.shape_cast %88 : vector<8x4xf32> to vector<8x4x1xf32>
    %90 = vector.broadcast %89 : vector<8x4x1xf32> to vector<8x4x32xf32>
    %91 = arith.mulf %90, %56 : vector<8x4x32xf32>
    %cst_39 = arith.constant dense<0.000000e+00> : vector<8x32xf32>
    %92 = vector.multi_reduction <add>, %91, %cst_39 [1] : vector<8x4x32xf32> to vector<8x32xf32>
    %cst_40 = arith.constant 0.000000e+00 : f32
    %93 = vector.broadcast %cst_40 : f32 to vector<8x32xf32>
    %94 = arith.cmpf ogt, %92, %93 : vector<8x32xf32>
    %95 = math.exp %92 : vector<8x32xf32>
    %cst_41 = arith.constant 1.000000e+00 : f32
    %96 = vector.broadcast %cst_41 : f32 to vector<8x32xf32>
    %97 = arith.subf %95, %96 : vector<8x32xf32>
    %98 = arith.select %94, %92, %97 : vector<8x32xi1>, vector<8x32xf32>
    %c0_42 = arith.constant 0 : index
    %c32 = arith.constant 32 : index
    %99 = vector.load %arg14[%c0_42, %c32] : memref<16x64xf32, #tpu.memory_space<vmem>>, vector<8x32xf32>
    tpu.vector_store %arg14[%c0_42, %c32], %98 {strides = array<i32>} : memref<16x64xf32, #tpu.memory_space<vmem>>, vector<8x32xf32>,
    %c0_43 = arith.constant 0 : index
    %c1 = arith.constant 1 : index
    %c0_44 = arith.constant 0 : index
    %c0_45 = arith.constant 0 : index
    %c0_46 = arith.constant 0 : index
    %100 = vector.load %arg1[%c0_43, %c1, %c0_44, %c0_45, %c0_46] : memref<1x2x8x4x64xf32, #tpu.memory_space<vmem>>, vector<1x1x8x4x64xf32>
    %101 = vector.shape_cast %100 : vector<1x1x8x4x64xf32> to vector<8x4x64xf32>
    %c0_47 = arith.constant 0 : index
    %c1_48 = arith.constant 1 : index
    %c0_49 = arith.constant 0 : index
    %c0_50 = arith.constant 0 : index
    %102 = vector.load %arg2[%c0_47, %c1_48, %c0_49, %c0_50] : memref<1x2x8x64xf32, #tpu.memory_space<vmem>>, vector<1x1x8x64xf32>
    %103 = vector.shape_cast %102 : vector<1x1x8x64xf32> to vector<8x64xf32>
    %c0_51 = arith.constant 0 : index
    %c1_52 = arith.constant 1 : index
    %c0_53 = arith.constant 0 : index
    %c0_54 = arith.constant 0 : index
    %104 = vector.load %arg3[%c0_51, %c1_52, %c0_53, %c0_54] : memref<1x2x8x4xf32, #tpu.memory_space<vmem>>, vector<1x1x8x4xf32>
    %105 = vector.shape_cast %104 : vector<1x1x8x4xf32> to vector<8x4xf32>
    %cst_55 = arith.constant 5.000000e-01 : f32
    %106 = vector.broadcast %cst_55 : f32 to vector<8x4xf32>
    %107 = arith.cmpf ogt, %105, %106 : vector<8x4xf32>
    %c1_56 = arith.constant 1 : index
    %c0_57 = arith.constant 0 : index
    %c0_58 = arith.constant 0 : index
    %108 = vector.load %arg4[%c1_56, %c0_57, %c0_58] : memref<2x2x32xf32, #tpu.memory_space<vmem>>, vector<1x2x32xf32>
    %109 = vector.shape_cast %108 : vector<1x2x32xf32> to vector<2x32xf32>
    %c1_59 = arith.constant 1 : index
    %c0_60 = arith.constant 0 : index
    %c0_61 = arith.constant 0 : index
    %110 = vector.load %arg5[%c1_59, %c0_60, %c0_61] : memref<2x2x32xf32, #tpu.memory_space<vmem>>, vector<1x2x32xf32>
    %111 = vector.shape_cast %110 : vector<1x2x32xf32> to vector<2x32xf32>
    %112 = vector.extract_strided_slice %101 {offsets = [0, 0, 0], sizes = [8, 4, 32], strides = [1, 1, 1]} : vector<8x4x64xf32> to vector<8x4x32xf32>
    %113 = vector.extract_strided_slice %103 {offsets = [0, 0], sizes = [8, 32], strides = [1, 1]} : vector<8x64xf32> to vector<8x32xf32>
    %114 = vector.extract_strided_slice %109 {offsets = [0, 0], sizes = [1, 32], strides = [1, 1]} : vector<2x32xf32> to vector<1x32xf32>
    %115 = vector.broadcast %114 : vector<1x32xf32> to vector<8x32xf32>
    %116 = arith.mulf %113, %115 : vector<8x32xf32>
    %cst_62 = arith.constant dense<0.000000e+00> : vector<8xf32>
    %117 = vector.multi_reduction <add>, %116, %cst_62 [1] : vector<8x32xf32> to vector<8xf32>
    %118 = vector.shape_cast %117 : vector<8xf32> to vector<8x1xf32>
    %119 = vector.extract_strided_slice %111 {offsets = [0, 0], sizes = [1, 32], strides = [1, 1]} : vector<2x32xf32> to vector<1x32xf32>
    %120 = vector.shape_cast %119 : vector<1x32xf32> to vector<1x1x32xf32>
    %121 = vector.broadcast %120 : vector<1x1x32xf32> to vector<8x4x32xf32>
    %122 = arith.mulf %112, %121 : vector<8x4x32xf32>
    %cst_63 = arith.constant dense<0.000000e+00> : vector<8x4xf32>
    %123 = vector.multi_reduction <add>, %122, %cst_63 [2] : vector<8x4x32xf32> to vector<8x4xf32>
    %124 = vector.broadcast %118 : vector<8x1xf32> to vector<8x4xf32>
    %125 = arith.addf %124, %123 : vector<8x4xf32>
    %cst_64 = arith.constant 0.000000e+00 : f32
    %126 = vector.broadcast %cst_64 : f32 to vector<8x4xf32>
    %127 = arith.cmpf oge, %125, %126 : vector<8x4xf32>
    %cst_65 = arith.constant 2.000000e-01 : f32
    %128 = vector.broadcast %cst_65 : f32 to vector<8x4xf32>
    %129 = arith.mulf %128, %125 : vector<8x4xf32>
    %130 = arith.select %127, %125, %129 : vector<8x4xi1>, vector<8x4xf32>
    %cst_66 = arith.constant -1.000000e+30 : f32
    %131 = vector.broadcast %cst_66 : f32 to vector<8x4xf32>
    %132 = arith.select %107, %130, %131 : vector<8x4xi1>, vector<8x4xf32>
    %cst_67 = arith.constant dense<0xFF800000> : vector<8xf32>
    %133 = vector.multi_reduction <maximumf>, %132, %cst_67 [1] : vector<8x4xf32> to vector<8xf32>
    %134 = vector.shape_cast %133 : vector<8xf32> to vector<8x1xf32>
    %135 = vector.broadcast %134 : vector<8x1xf32> to vector<8x4xf32>
    %136 = arith.subf %132, %135 : vector<8x4xf32>
    %137 = math.exp %136 : vector<8x4xf32>
    %cst_68 = arith.constant 0.000000e+00 : f32
    %138 = vector.broadcast %cst_68 : f32 to vector<8x4xf32>
    %139 = arith.select %107, %137, %138 : vector<8x4xi1>, vector<8x4xf32>
    %cst_69 = arith.constant dense<0.000000e+00> : vector<8xf32>
    %140 = vector.multi_reduction <add>, %139, %cst_69 [1] : vector<8x4xf32> to vector<8xf32>
    %141 = vector.shape_cast %140 : vector<8xf32> to vector<8x1xf32>
    %142 = tpu.reciprocal %141 {approx = true} : vector<8x1xf32> -> vector<8x1xf32>
    %143 = vector.broadcast %142 : vector<8x1xf32> to vector<8x4xf32>
    %144 = arith.mulf %139, %143 : vector<8x4xf32>
    %145 = vector.shape_cast %144 : vector<8x4xf32> to vector<8x4x1xf32>
    %146 = vector.broadcast %145 : vector<8x4x1xf32> to vector<8x4x32xf32>
    %147 = arith.mulf %146, %112 : vector<8x4x32xf32>
    %cst_70 = arith.constant dense<0.000000e+00> : vector<8x32xf32>
    %148 = vector.multi_reduction <add>, %147, %cst_70 [1] : vector<8x4x32xf32> to vector<8x32xf32>
    %cst_71 = arith.constant 0.000000e+00 : f32
    %149 = vector.broadcast %cst_71 : f32 to vector<8x32xf32>
    %150 = arith.cmpf ogt, %148, %149 : vector<8x32xf32>
    %151 = math.exp %148 : vector<8x32xf32>
    %cst_72 = arith.constant 1.000000e+00 : f32
    %152 = vector.broadcast %cst_72 : f32 to vector<8x32xf32>
    %153 = arith.subf %151, %152 : vector<8x32xf32>
    %154 = arith.select %150, %148, %153 : vector<8x32xi1>, vector<8x32xf32>
    %c8 = arith.constant 8 : index
    %c0_73 = arith.constant 0 : index
    %155 = vector.load %arg14[%c8, %c0_73] : memref<16x64xf32, #tpu.memory_space<vmem>>, vector<8x32xf32>
    tpu.vector_store %arg14[%c8, %c0_73], %154 {strides = array<i32>} : memref<16x64xf32, #tpu.memory_space<vmem>>, vector<8x32xf32>,
    %156 = vector.extract_strided_slice %101 {offsets = [0, 0, 32], sizes = [8, 4, 32], strides = [1, 1, 1]} : vector<8x4x64xf32> to vector<8x4x32xf32>
    %157 = vector.extract_strided_slice %103 {offsets = [0, 32], sizes = [8, 32], strides = [1, 1]} : vector<8x64xf32> to vector<8x32xf32>
    %158 = vector.extract_strided_slice %109 {offsets = [1, 0], sizes = [1, 32], strides = [1, 1]} : vector<2x32xf32> to vector<1x32xf32>
    %159 = vector.broadcast %158 : vector<1x32xf32> to vector<8x32xf32>
    %160 = arith.mulf %157, %159 : vector<8x32xf32>
    %cst_74 = arith.constant dense<0.000000e+00> : vector<8xf32>
    %161 = vector.multi_reduction <add>, %160, %cst_74 [1] : vector<8x32xf32> to vector<8xf32>
    %162 = vector.shape_cast %161 : vector<8xf32> to vector<8x1xf32>
    %163 = vector.extract_strided_slice %111 {offsets = [1, 0], sizes = [1, 32], strides = [1, 1]} : vector<2x32xf32> to vector<1x32xf32>
    %164 = vector.shape_cast %163 : vector<1x32xf32> to vector<1x1x32xf32>
    %165 = vector.broadcast %164 : vector<1x1x32xf32> to vector<8x4x32xf32>
    %166 = arith.mulf %156, %165 : vector<8x4x32xf32>
    %cst_75 = arith.constant dense<0.000000e+00> : vector<8x4xf32>
    %167 = vector.multi_reduction <add>, %166, %cst_75 [2] : vector<8x4x32xf32> to vector<8x4xf32>
    %168 = vector.broadcast %162 : vector<8x1xf32> to vector<8x4xf32>
    %169 = arith.addf %168, %167 : vector<8x4xf32>
    %cst_76 = arith.constant 0.000000e+00 : f32
    %170 = vector.broadcast %cst_76 : f32 to vector<8x4xf32>
    %171 = arith.cmpf oge, %169, %170 : vector<8x4xf32>
    %cst_77 = arith.constant 2.000000e-01 : f32
    %172 = vector.broadcast %cst_77 : f32 to vector<8x4xf32>
    %173 = arith.mulf %172, %169 : vector<8x4xf32>
    %174 = arith.select %171, %169, %173 : vector<8x4xi1>, vector<8x4xf32>
    %cst_78 = arith.constant -1.000000e+30 : f32
    %175 = vector.broadcast %cst_78 : f32 to vector<8x4xf32>
    %176 = arith.select %107, %174, %175 : vector<8x4xi1>, vector<8x4xf32>
    %cst_79 = arith.constant dense<0xFF800000> : vector<8xf32>
    %177 = vector.multi_reduction <maximumf>, %176, %cst_79 [1] : vector<8x4xf32> to vector<8xf32>
    %178 = vector.shape_cast %177 : vector<8xf32> to vector<8x1xf32>
    %179 = vector.broadcast %178 : vector<8x1xf32> to vector<8x4xf32>
    %180 = arith.subf %176, %179 : vector<8x4xf32>
    %181 = math.exp %180 : vector<8x4xf32>
    %cst_80 = arith.constant 0.000000e+00 : f32
    %182 = vector.broadcast %cst_80 : f32 to vector<8x4xf32>
    %183 = arith.select %107, %181, %182 : vector<8x4xi1>, vector<8x4xf32>
    %cst_81 = arith.constant dense<0.000000e+00> : vector<8xf32>
    %184 = vector.multi_reduction <add>, %183, %cst_81 [1] : vector<8x4xf32> to vector<8xf32>
    %185 = vector.shape_cast %184 : vector<8xf32> to vector<8x1xf32>
    %186 = tpu.reciprocal %185 {approx = true} : vector<8x1xf32> -> vector<8x1xf32>
    %187 = vector.broadcast %186 : vector<8x1xf32> to vector<8x4xf32>
    %188 = arith.mulf %183, %187 : vector<8x4xf32>
    %189 = vector.shape_cast %188 : vector<8x4xf32> to vector<8x4x1xf32>
    %190 = vector.broadcast %189 : vector<8x4x1xf32> to vector<8x4x32xf32>
    %191 = arith.mulf %190, %156 : vector<8x4x32xf32>
    %cst_82 = arith.constant dense<0.000000e+00> : vector<8x32xf32>
    %192 = vector.multi_reduction <add>, %191, %cst_82 [1] : vector<8x4x32xf32> to vector<8x32xf32>
    %cst_83 = arith.constant 0.000000e+00 : f32
    %193 = vector.broadcast %cst_83 : f32 to vector<8x32xf32>
    %194 = arith.cmpf ogt, %192, %193 : vector<8x32xf32>
    %195 = math.exp %192 : vector<8x32xf32>
    %cst_84 = arith.constant 1.000000e+00 : f32
    %196 = vector.broadcast %cst_84 : f32 to vector<8x32xf32>
    %197 = arith.subf %195, %196 : vector<8x32xf32>
    %198 = arith.select %194, %192, %197 : vector<8x32xi1>, vector<8x32xf32>
    %c8_85 = arith.constant 8 : index
    %c32_86 = arith.constant 32 : index
    %199 = vector.load %arg14[%c8_85, %c32_86] : memref<16x64xf32, #tpu.memory_space<vmem>>, vector<8x32xf32>
    tpu.vector_store %arg14[%c8_85, %c32_86], %198 {strides = array<i32>} : memref<16x64xf32, #tpu.memory_space<vmem>>, vector<8x32xf32>,
    %c0_87 = arith.constant 0 : index
    %c0_88 = arith.constant 0 : index
    %200 = vector.load %arg14[%c0_87, %c0_88] : memref<16x64xf32, #tpu.memory_space<vmem>>, vector<16x64xf32>
    %201 = arith.truncf %200 : vector<16x64xf32> to vector<16x64xbf16>
    %c0_89 = arith.constant 0 : index
    %c0_90 = arith.constant 0 : index
    %202 = vector.load %arg6[%c0_89, %c0_90] : memref<64x32xf32, #tpu.memory_space<vmem>>, vector<64x32xf32>
    %203 = arith.truncf %202 : vector<64x32xf32> to vector<64x32xbf16>
    %cst_91 = arith.constant dense<0.000000e+00> : vector<16x32xf32>
    %204 = tpu.matmul %201, %203, %cst_91 {dimension_numbers = #tpu.dot_dimension_numbers<[1], [0], [0], [1], [0, 0, 1, 1], [], []>} : vector<16x64xbf16>, vector<64x32xbf16>, vector<16x32xf32> -> vector<16x32xf32>
    %c0_92 = arith.constant 0 : index
    %c0_93 = arith.constant 0 : index
    %205 = vector.load %arg7[%c0_92, %c0_93] : memref<1x32xf32, #tpu.memory_space<vmem>>, vector<1x32xf32>
    %206 = vector.broadcast %205 : vector<1x32xf32> to vector<16x32xf32>
    %207 = arith.addf %204, %206 : vector<16x32xf32>
    %208 = math.tanh %207 : vector<16x32xf32>
    %209 = vector.extract_strided_slice %208 {offsets = [0, 0], sizes = [8, 32], strides = [1, 1]} : vector<16x32xf32> to vector<8x32xf32>
    %cst_94 = arith.constant dense<0.000000e+00> : vector<32xf32>
    %210 = vector.multi_reduction <add>, %209, %cst_94 [0] : vector<8x32xf32> to vector<32xf32>
    %211 = vector.shape_cast %210 : vector<32xf32> to vector<1x32xf32>
    %cst_95 = arith.constant 8.000000e+00 : f32
    %212 = vector.broadcast %cst_95 : f32 to vector<1x32xf32>
    %213 = arith.divf %211, %212 : vector<1x32xf32>
    %c0_96 = arith.constant 0 : index
    %c0_97 = arith.constant 0 : index
    %214 = vector.load %arg8[%c0_96, %c0_97] : memref<32x1xf32, #tpu.memory_space<vmem>>, vector<32x1xf32>
    %cst_98 = arith.constant dense<0.000000e+00> : vector<1x1xf32>
    %215 = tpu.matmul %213, %214, %cst_98 {dimension_numbers = #tpu.dot_dimension_numbers<[1], [0], [0], [1], [0, 0, 1, 1], [], []>} : vector<1x32xf32>, vector<32x1xf32>, vector<1x1xf32> -> vector<1x1xf32>
    %216 = vector.extract_strided_slice %208 {offsets = [8, 0], sizes = [8, 32], strides = [1, 1]} : vector<16x32xf32> to vector<8x32xf32>
    %cst_99 = arith.constant dense<0.000000e+00> : vector<32xf32>
    %217 = vector.multi_reduction <add>, %216, %cst_99 [0] : vector<8x32xf32> to vector<32xf32>
    %218 = vector.shape_cast %217 : vector<32xf32> to vector<1x32xf32>
    %cst_100 = arith.constant 8.000000e+00 : f32
    %219 = vector.broadcast %cst_100 : f32 to vector<1x32xf32>
    %220 = arith.divf %218, %219 : vector<1x32xf32>
    %c0_101 = arith.constant 0 : index
    %c0_102 = arith.constant 0 : index
    %221 = vector.load %arg8[%c0_101, %c0_102] : memref<32x1xf32, #tpu.memory_space<vmem>>, vector<32x1xf32>
    %cst_103 = arith.constant dense<0.000000e+00> : vector<1x1xf32>
    %222 = tpu.matmul %220, %221, %cst_103 {dimension_numbers = #tpu.dot_dimension_numbers<[1], [0], [0], [1], [0, 0, 1, 1], [], []>} : vector<1x32xf32>, vector<32x1xf32>, vector<1x1xf32> -> vector<1x1xf32>
    %223 = arith.maximumf %215, %222 : vector<1x1xf32>
    %224 = arith.subf %215, %223 : vector<1x1xf32>
    %225 = math.exp %224 : vector<1x1xf32>
    %226 = arith.subf %222, %223 : vector<1x1xf32>
    %227 = math.exp %226 : vector<1x1xf32>
    %228 = arith.addf %225, %227 : vector<1x1xf32>
    %229 = tpu.reciprocal %228 {approx = true} : vector<1x1xf32> -> vector<1x1xf32>
    %230 = arith.mulf %225, %229 : vector<1x1xf32>
    %231 = arith.mulf %227, %229 : vector<1x1xf32>
    %232 = vector.extract_strided_slice %200 {offsets = [0, 0], sizes = [8, 64], strides = [1, 1]} : vector<16x64xf32> to vector<8x64xf32>
    %233 = vector.broadcast %230 : vector<1x1xf32> to vector<8x64xf32>
    %234 = arith.mulf %233, %232 : vector<8x64xf32>
    %235 = vector.extract_strided_slice %200 {offsets = [8, 0], sizes = [8, 64], strides = [1, 1]} : vector<16x64xf32> to vector<8x64xf32>
    %236 = vector.broadcast %231 : vector<1x1xf32> to vector<8x64xf32>
    %237 = arith.mulf %236, %235 : vector<8x64xf32>
    %238 = arith.addf %234, %237 : vector<8x64xf32>
    %239 = arith.truncf %238 : vector<8x64xf32> to vector<8x64xbf16>
    %c0_104 = arith.constant 0 : index
    %c0_105 = arith.constant 0 : index
    %240 = vector.load %arg9[%c0_104, %c0_105] : memref<64x16xf32, #tpu.memory_space<vmem>>, vector<64x16xf32>
    %241 = arith.truncf %240 : vector<64x16xf32> to vector<64x16xbf16>
    %cst_106 = arith.constant dense<0.000000e+00> : vector<8x16xf32>
    %242 = tpu.matmul %239, %241, %cst_106 {dimension_numbers = #tpu.dot_dimension_numbers<[1], [0], [0], [1], [0, 0, 1, 1], [], []>} : vector<8x64xbf16>, vector<64x16xbf16>, vector<8x16xf32> -> vector<8x16xf32>
    %c0_107 = arith.constant 0 : index
    %c0_108 = arith.constant 0 : index
    %243 = vector.load %arg10[%c0_107, %c0_108] : memref<1x16xf32, #tpu.memory_space<vmem>>, vector<1x16xf32>
    %244 = vector.broadcast %243 : vector<1x16xf32> to vector<8x16xf32>
    %245 = arith.addf %242, %244 : vector<8x16xf32>
    %c0_109 = arith.constant 0 : index
    %c0_110 = arith.constant 0 : index
    %c0_111 = arith.constant 0 : index
    %246 = vector.load %arg11[%c0_109, %c0_110, %c0_111] : memref<1x8x64xf32, #tpu.memory_space<vmem>>, vector<1x8x64xf32>
    %247 = vector.shape_cast %246 : vector<1x8x64xf32> to vector<8x64xf32>
    %248 = vector.shape_cast %238 : vector<8x64xf32> to vector<1x8x64xf32>
    tpu.vector_store %arg11[%c0_109, %c0_110, %c0_111], %248 {strides = array<i32>} : memref<1x8x64xf32, #tpu.memory_space<vmem>>, vector<1x8x64xf32>,
    %c0_112 = arith.constant 0 : index
    %c0_113 = arith.constant 0 : index
    %c0_114 = arith.constant 0 : index
    %249 = vector.load %arg12[%c0_112, %c0_113, %c0_114] : memref<1x8x16xf32, #tpu.memory_space<vmem>>, vector<1x8x16xf32>
    %250 = vector.shape_cast %249 : vector<1x8x16xf32> to vector<8x16xf32>
    %251 = vector.shape_cast %245 : vector<8x16xf32> to vector<1x8x16xf32>
    tpu.vector_store %arg12[%c0_112, %c0_113, %c0_114], %251 {strides = array<i32>} : memref<1x8x16xf32, #tpu.memory_space<vmem>>, vector<1x8x16xf32>,
    %c0_115 = arith.constant 0 : index
    %c0_116 = arith.constant 0 : index
    %c0_117 = arith.constant 0 : index
    %252 = vector.load %arg13[%c0_115, %c0_116, %c0_117] : memref<1x1x2xf32, #tpu.memory_space<vmem>>, vector<1x1x1xf32>
    %253 = vector.shape_cast %252 : vector<1x1x1xf32> to vector<1x1xf32>
    %254 = vector.shape_cast %230 : vector<1x1xf32> to vector<1x1x1xf32>
    tpu.vector_store %arg13[%c0_115, %c0_116, %c0_117], %254 {strides = array<i32>} : memref<1x1x2xf32, #tpu.memory_space<vmem>>, vector<1x1x1xf32>,
    %c0_118 = arith.constant 0 : index
    %c0_119 = arith.constant 0 : index
    %c1_120 = arith.constant 1 : index
    %255 = vector.load %arg13[%c0_118, %c0_119, %c1_120] : memref<1x1x2xf32, #tpu.memory_space<vmem>>, vector<1x1x1xf32>
    %256 = vector.shape_cast %255 : vector<1x1x1xf32> to vector<1x1xf32>
    %257 = vector.shape_cast %231 : vector<1x1xf32> to vector<1x1x1xf32>
    tpu.vector_store %arg13[%c0_118, %c0_119, %c1_120], %257 {strides = array<i32>} : memref<1x1x2xf32, #tpu.memory_space<vmem>>, vector<1x1x1xf32>,
    return
  }
  func.func @transform_0(%arg0: i32) -> (i32, i32, i32, i32, i32) {
    %c0_i32 = arith.constant 0 : i32
    %c0_i32_0 = arith.constant 0 : i32
    %c0_i32_1 = arith.constant 0 : i32
    %c0_i32_2 = arith.constant 0 : i32
    %c0_i32_3 = arith.constant 0 : i32
    return %arg0, %c0_i32, %c0_i32_0, %c0_i32_1, %c0_i32_2 : i32, i32, i32, i32, i32
  }
  func.func @transform_1(%arg0: i32) -> (i32, i32, i32, i32) {
    %c0_i32 = arith.constant 0 : i32
    %c0_i32_0 = arith.constant 0 : i32
    %c0_i32_1 = arith.constant 0 : i32
    %c0_i32_2 = arith.constant 0 : i32
    return %arg0, %c0_i32, %c0_i32_0, %c0_i32_1 : i32, i32, i32, i32
  }
  func.func @transform_2(%arg0: i32) -> (i32, i32, i32, i32) {
    %c0_i32 = arith.constant 0 : i32
    %c0_i32_0 = arith.constant 0 : i32
    %c0_i32_1 = arith.constant 0 : i32
    %c0_i32_2 = arith.constant 0 : i32
    return %arg0, %c0_i32, %c0_i32_0, %c0_i32_1 : i32, i32, i32, i32
  }
  func.func @transform_3(%arg0: i32) -> (i32, i32, i32) {
    %c0_i32 = arith.constant 0 : i32
    %c0_i32_0 = arith.constant 0 : i32
    %c0_i32_1 = arith.constant 0 : i32
    %c0_i32_2 = arith.constant 0 : i32
    return %c0_i32, %c0_i32_0, %c0_i32_1 : i32, i32, i32
  }
  func.func @transform_4(%arg0: i32) -> (i32, i32, i32) {
    %c0_i32 = arith.constant 0 : i32
    %c0_i32_0 = arith.constant 0 : i32
    %c0_i32_1 = arith.constant 0 : i32
    %c0_i32_2 = arith.constant 0 : i32
    return %c0_i32, %c0_i32_0, %c0_i32_1 : i32, i32, i32
  }
  func.func @transform_5(%arg0: i32) -> (i32, i32) {
    %c0_i32 = arith.constant 0 : i32
    %c0_i32_0 = arith.constant 0 : i32
    %c0_i32_1 = arith.constant 0 : i32
    return %c0_i32, %c0_i32_0 : i32, i32
  }
  func.func @transform_6(%arg0: i32) -> (i32, i32) {
    %c0_i32 = arith.constant 0 : i32
    %c0_i32_0 = arith.constant 0 : i32
    %c0_i32_1 = arith.constant 0 : i32
    return %c0_i32, %c0_i32_0 : i32, i32
  }
  func.func @transform_7(%arg0: i32) -> (i32, i32) {
    %c0_i32 = arith.constant 0 : i32
    %c0_i32_0 = arith.constant 0 : i32
    %c0_i32_1 = arith.constant 0 : i32
    return %c0_i32, %c0_i32_0 : i32, i32
  }
  func.func @transform_8(%arg0: i32) -> (i32, i32) {
    %c0_i32 = arith.constant 0 : i32
    %c0_i32_0 = arith.constant 0 : i32
    %c0_i32_1 = arith.constant 0 : i32
    return %c0_i32, %c0_i32_0 : i32, i32
  }
  func.func @transform_9(%arg0: i32) -> (i32, i32) {
    %c0_i32 = arith.constant 0 : i32
    %c0_i32_0 = arith.constant 0 : i32
    %c0_i32_1 = arith.constant 0 : i32
    return %c0_i32, %c0_i32_0 : i32, i32
  }
  func.func @transform_10(%arg0: i32) -> (i32, i32, i32) {
    %c0_i32 = arith.constant 0 : i32
    %c0_i32_0 = arith.constant 0 : i32
    %c0_i32_1 = arith.constant 0 : i32
    return %arg0, %c0_i32, %c0_i32_0 : i32, i32, i32
  }
  func.func @transform_11(%arg0: i32) -> (i32, i32, i32) {
    %c0_i32 = arith.constant 0 : i32
    %c0_i32_0 = arith.constant 0 : i32
    %c0_i32_1 = arith.constant 0 : i32
    return %arg0, %c0_i32, %c0_i32_0 : i32, i32, i32
  }
  func.func @transform_12(%arg0: i32) -> (i32, i32, i32) {
    %c0_i32 = arith.constant 0 : i32
    %c0_i32_0 = arith.constant 0 : i32
    %c0_i32_1 = arith.constant 0 : i32
    return %arg0, %c0_i32, %c0_i32_0 : i32, i32, i32
  }
}

</mosaic_0001>

<bundles_post_ra>
// kernel: tpu_custom_call.1
= control target key start
LH: loop header
LB: loop body
LE: loop exit
PB: predicated region body
PF: predicated region fallthrough
CT: control target
= control target key end

     0   :  { %s3690_s0 = inlined_call_operand.vmem [shape: f32[2,2,8,4,64], index: 0, kind: input, shape index: {}]   ;;  %s3691_s1 = inlined_call_operand.vmem [shape: f32[2,2,8,64], index: 1, kind: input, shape index: {}]   ;;  %s3692_s2 = inlined_call_operand.vmem [shape: f32[2,2,8,4], index: 2, kind: input, shape index: {}]   ;;  %s3693_s3 = inlined_call_operand.vmem [shape: f32[2,2,32], index: 3, kind: input, shape index: {}]   ;;  %s3694_s4 = inlined_call_operand.vmem [shape: f32[2,2,32], index: 4, kind: input, shape index: {}]   ;;  %s3695_s5 = inlined_call_operand.vmem [shape: f32[64,32], index: 5, kind: input, shape index: {}]   ;;  %s3696_s6 = inlined_call_operand.vmem [shape: f32[1,32], index: 6, kind: input, shape index: {}]   ;;  %s3697_s7 = inlined_call_operand.vmem [shape: f32[32,1], index: 7, kind: input, shape index: {}]   ;;  %s3698_s8 = inlined_call_operand.vmem [shape: f32[64,16], index: 8, kind: input, shape index: {}]   ;;  %s3699_s9 = inlined_call_operand.vmem [shape: f32[1,16], index: 9, kind: input, shape index: {}]   ;;  %s3700_s10 = inlined_call_operand.hbm [shape: f32[2,8,64], index: 10, kind: output, shape index: {0}]   ;;  %s3701_s11 = inlined_call_operand.hbm [shape: f32[2,8,16], index: 11, kind: output, shape index: {1}]   ;;  %s3702_s12 = inlined_call_operand.hbm [shape: f32[2,1,2], index: 12, kind: output, shape index: {2}]  }
   0x1   :  { %3708 = sst [smem:[#allocation10_spill]] %s3690_s0 }
   0x2   :  { %3709 = sst [smem:[#allocation11_spill]] %s3691_s1 }
   0x3   :  { %3710 = sst [smem:[#allocation12_spill]] %s3692_s2 }
   0x4   :  { %3711 = sst [smem:[#allocation13_spill]] %s3693_s3 }
   0x5   :  { %3712 = sst [smem:[#allocation14_spill]] %s3694_s4 }
   0x6   :  { %3713 = sst [smem:[#allocation15_spill]] %s3695_s5 }
   0x7   :  { %3714 = sst [smem:[#allocation16_spill]] %s3696_s6 }
   0x8   :  { %18 = vsyncpa [#allocation4], 0 }
   0x9   :  { %20 = vsyncpa [#allocation4 + $0x1], 0 }
   0xa   :  { %21 = vsyncpa [#allocation6], 0 }
   0xb   :  { %23 = vsyncpa [#allocation6 + $0x1], 0  ;;  %s2780_s21 = smov 0   ;;  %s2782_s22 = smov 0  }
   0xc   :  { %s2784_s23 = smov 0   ;;  %s2786_s24 = smov 0  }
   0xd LB: > { %s2801_s25 = sadd.s32 4294967295, %s2704_s24   ;;  %s3703_s26 = sadd.s32 4294967294, %s2704_s24   ;;  %s2704_s24 = sphi %s2786_s24, %s3731_s24   ;;  %s2700_s23 = sphi %s2784_s23, %s3730_s23   ;;  %s2696_s22 = sphi %s2782_s22, %s3729_s22   ;;  %s2692_s21 = sphi %s2780_s21, %s3728_s21  }
   0xe   : > { %s2805_s27 = sadd.s32 1, %s2704_s24   ;;  %s261_s28 = sadd.s32 1, %s2700_s23 }
   0xf   : > { %s258_s29 = ssub.s32 %s2704_s24, %s2805_s27  ;;  %p271_p0 = scmp.ne.s32.totalorder %s2700_s23, %s2696_s22 }
  0x10   : > { %p259_p1 = scmp.eq.s32.totalorder %s258_s29, 0  ;;  %p272_p2 = scmp.eq.s32.totalorder %s2801_s25, 1 }
  0x11   : > { %p277_p3 = scmp.ne.s32.totalorder %s2696_s22, %s2692_s21  ;;  %p278_p4 = scmp.eq.s32.totalorder %s3703_s26, 1 }
  0x12   : > { %s2818_s30 = scalar_select %p259_p1, %s2700_s23, %s261_s28  }
  0x13   : > { %p2820_p5 = por %p272_p2, %p271_p0  ;;  %p2824_p6 = por %p278_p4, %p277_p3 }
  0x14   : > { %p2270_p7 = scmp.ge.s32.totalorder %s2704_s24, 1  ;;  %p393_p8 = scmp.lt.s32.totalorder %s2704_s24, 3 }
  0x16   : > { %p394_p9 = pnand %p2270_p7, %p393_p8 }
  0x17   : > { %v483_v0 = vlaneseq (!%p394_p9)  ;;  %s3717_s4 = sld [smem:[#allocation14_spill]] (!%p394_p9)  ;;  %s3718_s3 = sld [smem:[#allocation13_spill]] (!%p394_p9)  ;;  %vm504_vm0 = vcmask (!%p394_p9), 257024   ;;  %vm571_vm1 = vcmask (!%p394_p9), 1041409   ;;  %vm573_vm2 = vcmask (!%p394_p9), 1042434  }
  0x18   : > { %397 = sbr.rel (%p394_p9) target bundleno = 1783 (0x6f7), region = 60  ;;  %s2706_s15 = smov (!%p394_p9), 32   ;;  %vm575_vm3 = vcmask (!%p394_p9), 1043459   ;;  %vm577_vm4 = vcmask (!%p394_p9), 1044484   ;;  %vm488_vm5 = vcmask (!%p394_p9), 261120   ;;  %vm579_vm6 = vcmask (!%p394_p9), 1045509  }
  0x19   : > { %v2831_v1 = vshrl.u32 (!%p394_p9), %v483_v0, 7  ;;  %p454_p10 = scmp.lt.s32.totalorder (!%p394_p9), %s2801_s25, 1  ;;  %s3719_s0 = sld [smem:[#allocation10_spill]] (!%p394_p9)  ;;  %vm581_vm7 = vcmask (!%p394_p9), 1046534   ;;  %vm583_vm8 = vcmask (!%p394_p9), 1047559   ;;  %vm591_vm11 = vcmask (!%p394_p9), 31744  }
  0x1a   : > { %s3720_s1 = sld [smem:[#allocation11_spill]] (!%p394_p9)  ;;  %s2707_s18 = smov (!%p394_p9), 96  }
  0x1b   : > { %v2837_v3 = vsub.s32 (!%p394_p9), 1, %v2831_v1  ;;  %v2861_v11 = vsub.s32 (!%p394_p9), 0, %v2831_v1  ;;  %s3721_s2 = sld [smem:[#allocation12_spill]] (!%p394_p9)  ;;  %s3722_s5 = sld [smem:[#allocation15_spill]] (!%p394_p9) }
  0x1c   : > { %s3724_s6 = sld [smem:[#allocation16_spill]] (!%p394_p9)  ;;  %s3707_s19 = sshll.u32 (!%p394_p9), %s2801_s25, 7 }
  0x1d   : > { %v482_v2 = vld [vmem:[%s3717_s4] sm:$0x3] (!%p394_p9)  ;;  %v2306_v5 = vld [vmem:[%s3717_s4 + $0x2] sm:$0x3] (!%p394_p9) }
  0x1e   : > { %v481_v4 = vld [vmem:[%s3718_s3] sm:$0x3] (!%p394_p9)  ;;  %v800_v6 = vrot.slane (!%p394_p9), %v482_v2, %v2837_v3  ;;  %v2849_v7 = vld [vmem:[%s3718_s3 + $0x2] sm:$0x3] (!%p394_p9)  ;;  %v1436_v9 = vrot.slane (!%p394_p9), %v2306_v5, %v2837_v3  ;;  %v2872_v13 = vrot.slane (!%p394_p9), %v482_v2, %v2861_v11  ;;  %v2875_v14 = vrot.slane (!%p394_p9), %v2306_v5, %v2861_v11 }
  0x1f   : > { %v784_v8 = vrot.slane %v481_v4, %v2837_v3  ;;  %v1420_v10 = vrot.slane %v2849_v7, %v2837_v3  ;;  %s2857_s16 = scalar_select %p454_p10, %s2801_s25, 1  ;;  %v486_v41 = vrot.slane %v481_v4, %v2861_v11 }
  0x20   : > { %802 = vrot.lane.b32.xlu0 %v800_v6, %s2706_s15 }
  0x21   : > { %786 = vrot.lane.b32.xlu1 %v784_v8, %s2706_s15  ;;  %s2336_s17 = sshll.u32 %s2857_s16, 6  ;;  %s2337_s28 = sshll.u32 %s2857_s16, 4 }
  0x22   : > { %s2866_s20 = scalar_lea.vmem %s3719_s0, %s2336_s17  ;;  %s2935_s17 = scalar_lea.vmem %s3720_s1, %s2337_s28 }
  0x23   : > { %v2869_v12 = vld [vmem:[%s2866_s20] sm:$0xf]  ;;  %v2883_v17 = vld [vmem:[%s2866_s20 + $0x4] sm:$0xf]  ;;  %v2894_v22 = vld [vmem:[%s2866_s20 + $0x8] sm:$0xf] }
  0x24   : > { %1438 = vrot.lane.b32.xlu0 %v1436_v9, %s2706_s15  ;;  %v496_v15 = vmul.f32 %v2872_v13, %v2869_v12  ;;  %v2880_v16 = vld [vmem:[%s2866_s20 + $0x20] sm:$0xf]  ;;  %v2889_v20 = vld [vmem:[%s2866_s20 + $0x24] sm:$0xf]  ;;  %v497_v21 = vmul.f32 %v2872_v13, %v2883_v17  ;;  %v2900_v25 = vld [vmem:[%s2866_s20 + $0x28] sm:$0xf]  ;;  %v498_v27 = vmul.f32 %v2872_v13, %v2894_v22 }
  0x25   : > { %1422 = vrot.lane.b32.xlu1 %v1420_v10, %s2706_s15  ;;  %v1143_v19 = vmul.f32 %v2880_v16, %v2875_v14  ;;  %v1144_v24 = vmul.f32 %v2889_v20, %v2875_v14  ;;  %v2906_v28 = vld [vmem:[%s2866_s20 + $0xc] sm:$0xf]  ;;  %v1145_v30 = vmul.f32 %v2900_v25, %v2875_v14  ;;  %v2922_v37 = vld [vmem:[%s2866_s20 + $0x10] sm:$0xf]  ;;  %v478_v42 = vld [vmem:[%s2935_s17] sm:$0xff]  ;;  %s468_s15 = scalar_lea.vmem %s3721_s2, %s2337_s28 }
  0x26   : > { %v505_v18 = vsel %vm504_vm0, %v496_v15, 0.0  ;;  %v508_v26 = vsel %vm504_vm0, %v497_v21, 0.0  ;;  %v511_v31 = vsel %vm504_vm0, %v498_v27, 0.0  ;;  %v499_v32 = vmul.f32 %v2872_v13, %v2906_v28  ;;  %v2915_v33 = vld [vmem:[%s2866_s20 + $0x2c] sm:$0xf] }
  0x27   : > { %v1151_v23 = vsel %vm504_vm0, %v1143_v19, 0.0  ;;  %v1154_v29 = vsel %vm504_vm0, %v1144_v24, 0.0  ;;  %v1157_v34 = vsel %vm504_vm0, %v1145_v30, 0.0  ;;  %v1146_v36 = vmul.f32 %v2915_v33, %v2875_v14  ;;  %v2955_v54 = vld [vmem:[%s2866_s20 + $0x30] sm:$0xf]  ;;  %v2303_v9 = vld [vmem:[%s2935_s17 + $0x8] sm:$0xff] }
  0x28   : > { %v514_v35 = vsel %vm504_vm0, %v499_v32, 0.0  ;;  %v500_v39 = vmul.f32 %v2872_v13, %v2922_v37  ;;  %v2938_v43 = vmul.f32 %v486_v41, %v478_v42  ;;  %v2962_v57 = vld [vmem:[%s2866_s20 + $0x34] sm:$0xf]  ;;  %v2972_v61 = vld [vmem:[%s2866_s20 + $0x38] sm:$0xf]  ;;  %v538_v21 = vand.u32 127, %v483_v0 }
  0x29   : > { %v1160_v38 = vsel %vm504_vm0, %v1146_v36, 0.0  ;;  %v2965_v58 = vld [vmem:[%s2866_s20 + $0x14] sm:$0xf]  ;;  %v2975_v62 = vld [vmem:[%s2866_s20 + $0x18] sm:$0xf]  ;;  %v1147_v27 = vmul.f32 %v2955_v54, %v2875_v14 }
  0x2a   : > { %v517_v40 = vsel %vm504_vm0, %v500_v39, 0.0  ;;  %v2302_v5 = vld [vmem:[%s2866_s20 + $0x3c] sm:$0xf]  ;;  %v501_v32 = vmul.f32 %v2872_v13, %v2965_v58 }
  0x2b   : > { %v477_v6 = vld [vmem:[%s2866_s20 + $0x1c] sm:$0xf] }
  0x2c   : > { %v520_v39 = vsel %vm504_vm0, %v501_v32, 0.0 }
  0x43   : > { %506 = vadd.xlane.f32.xlu0 %v505_v18 }
  0x47   : > { %1152 = vadd.xlane.f32.xlu0 %v1151_v23  ;;  %v2992_v23 = vsub.s32 %v538_v21, %v2831_v1 }
  0x49   : > { %509 = vadd.xlane.f32.xlu1 %v508_v26 }
  0x4b   : > { %1155 = vadd.xlane.f32.xlu0 %v1154_v29 }
  0x4d   : > { %512 = vadd.xlane.f32.xlu1 %v511_v31  ;;  %v1163_v31 = vsel %vm504_vm0, %v1147_v27, 0.0 }
  0x4f   : > { %1158 = vadd.xlane.f32.xlu0 %v1157_v34 }
  0x51   : > { %515 = vadd.xlane.f32.xlu1 %v514_v35 }
  0x55   : > { %1161 = vadd.xlane.f32.xlu1 %v1160_v38 }
  0x59   : > { %518 = vadd.xlane.f32.xlu1 %v517_v40  ;;  %v1148_v40 = vmul.f32 %v2962_v57, %v2875_v14 }
  0x92   : > { %v803_v44 = vpop.permute.xlu0 %802 }
  0x93   : > { %v806_v45 = vmul.f32 %v803_v44, %v2883_v17  ;;  %v805_v46 = vmul.f32 %v803_v44, %v2869_v12  ;;  %v807_v51 = vmul.f32 %v803_v44, %v2894_v22  ;;  %v808_v53 = vmul.f32 %v803_v44, %v2906_v28  ;;  %v787_v63 = vpop.permute.xlu1 %786 }
  0x94   : > { %v809_v56 = vmul.f32 %v803_v44, %v2922_v37  ;;  %v810_v60 = vmul.f32 %v803_v44, %v2965_v58  ;;  %v811_v4 = vmul.f32 %v803_v44, %v2975_v62  ;;  %v812_v15 = vmul.f32 %v803_v44, %v477_v6 }
  0x95   : > { %823 = vrot.lane.b32.xlu1 %v806_v45, %s2707_s18  ;;  %821 = vrot.lane.b32.xlu0 %v805_v46, %s2707_s18  ;;  %v789_v18 = vmul.f32 %v787_v63, %v478_v42 }
  0x96   : > { %v1439_v47 = vpop.permute.xlu0 %1438 }
  0x97   : > { %v1442_v48 = vmul.f32 %v2889_v20, %v1439_v47  ;;  %v1441_v49 = vmul.f32 %v2880_v16, %v1439_v47  ;;  %v1443_v50 = vmul.f32 %v2900_v25, %v1439_v47  ;;  %v1444_v52 = vmul.f32 %v2915_v33, %v1439_v47  ;;  %v1423_v8 = vpop.permute.xlu1 %1422 }
  0x98   : > { %v1445_v55 = vmul.f32 %v2955_v54, %v1439_v47  ;;  %v1446_v59 = vmul.f32 %v2962_v57, %v1439_v47  ;;  %v1447_v2 = vmul.f32 %v2972_v61, %v1439_v47  ;;  %v1448_v10 = vmul.f32 %v2302_v5, %v1439_v47 }
  0x99   : > { %1459 = vrot.lane.b32.xlu1 %v1442_v48, %s2707_s18  ;;  %1457 = vrot.lane.b32.xlu0 %v1441_v49, %s2707_s18  ;;  %v1425_v19 = vmul.f32 %v2303_v9, %v1423_v8  ;;  %v1166_v48 = vsel %vm504_vm0, %v1148_v40, 0.0  ;;  %v502_v49 = vmul.f32 %v2872_v13, %v2975_v62 }
  0x9d   : > { %1461 = vrot.lane.b32.xlu1 %v1443_v50, %s2707_s18  ;;  %825 = vrot.lane.b32.xlu0 %v807_v51, %s2707_s18 }
  0xa1   : > { %1463 = vrot.lane.b32.xlu1 %v1444_v52, %s2707_s18  ;;  %827 = vrot.lane.b32.xlu0 %v808_v53, %s2707_s18 }
  0xa5   : > { %1465 = vrot.lane.b32.xlu1 %v1445_v55, %s2707_s18  ;;  %829 = vrot.lane.b32.xlu0 %v809_v56, %s2707_s18  ;;  %v523_v55 = vsel %vm504_vm0, %v502_v49, 0.0  ;;  %v1149_v56 = vmul.f32 %v2972_v61, %v2875_v14 }
  0xa9   : > { %1467 = vrot.lane.b32.xlu1 %v1446_v59, %s2707_s18  ;;  %831 = vrot.lane.b32.xlu0 %v810_v60, %s2707_s18 }
  0xad   : > { %1469 = vrot.lane.b32.xlu1 %v1447_v2, %s2707_s18  ;;  %833 = vrot.lane.b32.xlu0 %v811_v4, %s2707_s18  ;;  %v1169_v2 = vsel %vm504_vm0, %v1149_v56, 0.0  ;;  %v503_v4 = vmul.f32 %v2872_v13, %v477_v6 }
  0xb1   : > { %1471 = vrot.lane.b32.xlu1 %v1448_v10, %s2707_s18  ;;  %835 = vrot.lane.b32.xlu0 %v812_v15, %s2707_s18 }
  0xb5   : > { %1427 = vrot.lane.b32.xlu1 %v1425_v19, %s2707_s18  ;;  %791 = vrot.lane.b32.xlu0 %v789_v18, %s2707_s18  ;;  %v526_v18 = vsel %vm504_vm0, %v503_v4, 0.0  ;;  %v1150_v19 = vmul.f32 %v2302_v5, %v2875_v14 }
  0xb7   : > { %v1172_v21 = vsel %vm504_vm0, %v1150_v19, 0.0 }
  0xd0   : > { %v507_v24 = vpop.xlane.xlu0 %506 }
  0xd1   : > { %v542_v26 = vrot.slane %v507_v24, %v2992_v23  ;;  %v1134_v24 = vrot.slane %v2849_v7, %v2861_v11 }
  0xd3   : > { %v1135_v13 = vmul.f32 %v2303_v9, %v1134_v24  ;;  %v489_v9 = vsel %vm488_vm5, %v2938_v43, 0.0 }
  0xd4   : > { %v1153_v29 = vpop.xlane.xlu0 %1152 }
  0xd5   : > { %v1186_v30 = vrot.slane %v1153_v29, %v2992_v23 }
  0xd6   : > { %v510_v34 = vpop.xlane.xlu1 %509 }
  0xd7   : > { %v546_v0 = vrot.slane %v510_v34, %v2992_v23 }
  0xd8   : > { %v1156_v35 = vpop.xlane.xlu0 %1155 }
  0xd9   : > { %1164 = vadd.xlane.f32.xlu1 %v1163_v31  ;;  %v572_v36 = vsel %vm571_vm1, %v546_v0, %v542_v26  ;;  %v1190_v38 = vrot.slane %v1156_v35, %v2992_v23 }
  0xda   : > { %v513_v41 = vpop.xlane.xlu1 %512 }
  0xdb   : > { %v550_v42 = vrot.slane %v513_v41, %v2992_v23  ;;  %v1215_v44 = vsel %vm571_vm1, %v1190_v38, %v1186_v30  ;;  %v1136_v30 = vsel %vm488_vm5, %v1135_v13, 0.0 }
  0xdc   : > { %v1159_v45 = vpop.xlane.xlu0 %1158 }
  0xdd   : > { %521 = vadd.xlane.f32.xlu1 %v520_v39  ;;  %v574_v46 = vsel %vm573_vm2, %v550_v42, %v572_v36  ;;  %v1194_v47 = vrot.slane %v1159_v45, %v2992_v23 }
  0xde   : > { %v516_v50 = vpop.xlane.xlu1 %515 }
  0xdf   : > { %v554_v51 = vrot.slane %v516_v50, %v2992_v23  ;;  %v1216_v52 = vsel %vm573_vm2, %v1194_v47, %v1215_v44 }
  0xe1   : > { %1167 = vadd.xlane.f32.xlu1 %v1166_v48  ;;  %v576_v53 = vsel %vm575_vm3, %v554_v51, %v574_v46 }
  0xe2   : > { %v1162_v59 = vpop.xlane.xlu1 %1161 }
  0xe3   : > { %v1198_v60 = vrot.slane %v1162_v59, %v2992_v23 }
  0xe5   : > { %524 = vadd.xlane.f32.xlu1 %v523_v55  ;;  %v3022_v63 = vsel %vm575_vm3, %v1198_v60, %v1216_v52 }
  0xe6   : > { %v519_v8 = vpop.xlane.xlu1 %518 }
  0xe7   : > { %v558_v10 = vrot.slane %v519_v8, %v2992_v23 }
  0xe9   : > { %1170 = vadd.xlane.f32.xlu1 %v1169_v2  ;;  %v3028_v15 = vsel %vm577_vm4, %v558_v10, %v576_v53 }
  0xed   : > { %527 = vadd.xlane.f32.xlu1 %v526_v18 }
  0xf1   : > { %1173 = vadd.xlane.f32.xlu1 %v1172_v21 }
 0x107   : > { %v824_v6 = vpop.permute.xlu1 %823  ;;  %v822_v26 = vpop.permute.xlu0 %821 }
 0x108   : > { %v848_v27 = vsel %vm504_vm0, %v824_v6, 0.0  ;;  %v845_v29 = vsel %vm504_vm0, %v822_v26, 0.0 }
 0x109   : > { %849 = vadd.xlane.f32.xlu1 %v848_v27  ;;  %846 = vadd.xlane.f32.xlu0 %v845_v29 }
 0x10b   : > { %v1458_v14 = vpop.permute.xlu0 %1457  ;;  %v1460_v31 = vpop.permute.xlu1 %1459 }
 0x10c   : > { %v1481_v5 = vsel %vm504_vm0, %v1458_v14, 0.0  ;;  %v1484_v7 = vsel %vm504_vm0, %v1460_v31, 0.0 }
 0x10d   : > { %1137 = vadd.xlane.f32.xlu0 %v1136_v30  ;;  %1482 = vadd.xlane.f32.xlu1 %v1481_v5 }
 0x10f   : > { %v826_v32 = vpop.permute.xlu0 %825  ;;  %v1462_v35 = vpop.permute.xlu1 %1461 }
 0x110   : > { %v851_v0 = vsel %vm504_vm0, %v826_v32, 0.0  ;;  %v1487_v38 = vsel %vm504_vm0, %v1462_v35, 0.0 }
 0x111   : > { %1485 = vadd.xlane.f32.xlu0 %v1484_v7  ;;  %490 = vadd.xlane.f32.xlu1 %v489_v9 }
 0x113   : > { %v828_v34 = vpop.permute.xlu0 %827  ;;  %v1464_v41 = vpop.permute.xlu1 %1463 }
 0x114   : > { %v854_v40 = vsel %vm504_vm0, %v828_v34, 0.0  ;;  %v1490_v43 = vsel %vm504_vm0, %v1464_v41, 0.0 }
 0x115   : > { %852 = vadd.xlane.f32.xlu0 %v851_v0 }
 0x117   : > { %v830_v36 = vpop.permute.xlu0 %829  ;;  %v1466_v47 = vpop.permute.xlu1 %1465 }
 0x118   : > { %v857_v45 = vsel %vm504_vm0, %v830_v36, 0.0  ;;  %v1493_v49 = vsel %vm504_vm0, %v1466_v47, 0.0 }
 0x119   : > { %1488 = vadd.xlane.f32.xlu0 %v1487_v38  ;;  %v3077_v38 = vld [vmem:[%s468_s15 + $0x8] sm:$0xff] }
 0x11a   : > { %vm1126_vm9 = vcmp.gt.f32.partialorder %v3077_v38, 0.5  ;;  %v620_v38 = vsub.s32 2, %v2831_v1 }
 0x11b   : > { %v832_v39 = vpop.permute.xlu0 %831  ;;  %v1468_v52 = vpop.permute.xlu1 %1467 }
 0x11c   : > { %v860_v51 = vsel %vm504_vm0, %v832_v39, 0.0  ;;  %v1496_v53 = vsel %vm504_vm0, %v1468_v52, 0.0 }
 0x11d   : > { %855 = vadd.xlane.f32.xlu0 %v854_v40 }
 0x11f   : > { %v834_v42 = vpop.permute.xlu0 %833  ;;  %v1470_v55 = vpop.permute.xlu1 %1469 }
 0x120   : > { %v863_v56 = vsel %vm504_vm0, %v834_v42, 0.0  ;;  %v1499_v59 = vsel %vm504_vm0, %v1470_v55, 0.0 }
 0x121   : > { %1491 = vadd.xlane.f32.xlu0 %v1490_v43  ;;  %v3080_v43 = vld [vmem:[%s468_s15] sm:$0xff]  ;;  %s3561_s15 = sand.u32 1, %s2696_s22  }
 0x122   : > { %vm480_vm12 = vcmp.gt.f32.partialorder %v3080_v43, 0.5  ;;  %s3564_s16 = scalar_lea.vmem [#allocation7], %s3561_s15  ;;  %s3706_s17 = sshll.u32 %s3561_s15, 3 }
 0x123   : > { %v836_v44 = vpop.permute.xlu0 %835  ;;  %v1472_v60 = vpop.permute.xlu1 %1471  ;;  %s440_s18 = scalar_lea.vmem [#allocation3], %s3706_s17  ;;  %s2079_s0 = scalar_lea.sflag [#allocation4], %s3561_s15 }
 0x124   : > { %v866_v46 = vsel %vm504_vm0, %v836_v44, 0.0  ;;  %v1502_v2 = vsel %vm504_vm0, %v1472_v60, 0.0  ;;  %s2712_s17 = smov [#allocation3]  }
 0x125   : > { %858 = vadd.xlane.f32.xlu0 %v857_v45  ;;  %867 = vadd.xlane.f32.xlu1 %v866_v46  ;;  %s2586_s2 = sshll.u32 %s2712_s17, 4  ;;  %s2587_s2 = int_to_ptr.vmem [resolvable:$false] %s2586_s2 }
 0x126   : > { %s2588_s3 = scalar_lea.vmem %s2587_s2, 256 }
 0x127   : > { %v792_v48 = vpop.permute.xlu0 %791  ;;  %v1428_v4 = vpop.permute.xlu1 %1427 }
 0x128   : > { %v794_v50 = vsel %vm488_vm5, %v792_v48, 0.0  ;;  %v1430_v8 = vsel %vm488_vm5, %v1428_v4, 0.0 }
 0x129   : > { %1494 = vadd.xlane.f32.xlu0 %v1493_v49  ;;  %795 = vadd.xlane.f32.xlu1 %v794_v50 }
 0x12d   : > { %861 = vadd.xlane.f32.xlu0 %v860_v51 }
 0x131   : > { %1497 = vadd.xlane.f32.xlu0 %v1496_v53 }
 0x135   : > { %864 = vadd.xlane.f32.xlu0 %v863_v56 }
 0x139   : > { %1500 = vadd.xlane.f32.xlu0 %v1499_v59 }
 0x13d   : > { %1503 = vadd.xlane.f32.xlu0 %v1502_v2 }
 0x141   : > { %1431 = vadd.xlane.f32.xlu0 %v1430_v8 }
 0x166   : > { %v1165_v10 = vpop.xlane.xlu1 %1164 }
 0x167   : > { %v1202_v18 = vrot.slane %v1165_v10, %v2992_v23 }
 0x169   : > { %v1218_v19 = vsel %vm577_vm4, %v1202_v18, %v3022_v63 }
 0x16a   : > { %v522_v21 = vpop.xlane.xlu1 %521 }
 0x16b   : > { %v562_v24 = vrot.slane %v522_v21, %v2992_v23 }
 0x16d   : > { %v580_v13 = vsel %vm579_vm6, %v562_v24, %v3028_v15 }
 0x16e   : > { %v1168_v6 = vpop.xlane.xlu1 %1167 }
 0x16f   : > { %v1206_v26 = vrot.slane %v1168_v6, %v2992_v23 }
 0x171   : > { %v1219_v27 = vsel %vm579_vm6, %v1206_v26, %v1218_v19 }
 0x172   : > { %v525_v29 = vpop.xlane.xlu1 %524 }
 0x173   : > { %v566_v30 = vrot.slane %v525_v29, %v2992_v23 }
 0x175   : > { %v582_v14 = vsel %vm581_vm7, %v566_v30, %v580_v13 }
 0x176   : > { %v1171_v63 = vpop.xlane.xlu1 %1170 }
 0x177   : > { %v1210_v5 = vrot.slane %v1171_v63, %v2992_v23 }
 0x179   : > { %v1220_v31 = vsel %vm581_vm7, %v1210_v5, %v1219_v27 }
 0x17a   : > { %v528_v7 = vpop.xlane.xlu1 %527 }
 0x17b   : > { %v570_v15 = vrot.slane %v528_v7, %v2992_v23 }
 0x17d   : > { %v584_v9 = vsel %vm583_vm8, %v570_v15, %v582_v14 }
 0x17e   : > { %v1174_v32 = vpop.xlane.xlu1 %1173 }
 0x17f   : > { %v1214_v34 = vrot.slane %v1174_v32, %v2992_v23 }
 0x181   : > { %v1221_v0 = vsel %vm583_vm8, %v1214_v34, %v1220_v31 }
 0x196   : > { %v850_v35 = vpop.xlane.xlu1 %849  ;;  %v847_v36 = vpop.xlane.xlu0 %846 }
 0x197   : > { %v884_v10 = vrot.slane %v850_v35, %v2992_v23  ;;  %v880_v18 = vrot.slane %v847_v36, %v2992_v23 }
 0x199   : > { %v909_v6 = vsel %vm571_vm1, %v884_v10, %v880_v18 }
 0x19a   : > { %v1483_v39 = vpop.xlane.xlu1 %1482  ;;  %v1138_v40 = vpop.xlane.xlu0 %1137 }
 0x19b   : > { %v1223_v41 = vadd.f32 %v1221_v0, %v1138_v40  ;;  %v1516_v63 = vrot.slane %v1483_v39, %v2992_v23 }
 0x19d   : > { %v1225_v42 = vmul.f32 0.2, %v1223_v41  ;;  %vm1224_vm10 = vcmp.ge.f32.partialorder %v1223_v41, 0.0 }
 0x19e   : > { %v491_v44 = vpop.xlane.xlu1 %490  ;;  %v1486_v45 = vpop.xlane.xlu0 %1485 }
 0x19f   : > { %v586_v46 = vadd.f32 %v584_v9, %v491_v44  ;;  %v1226_v47 = vsel %vm1224_vm10, %v1223_v41, %v1225_v42  ;;  %v1520_v5 = vrot.slane %v1486_v45, %v2992_v23 }
 0x1a0   : > { %v3084_v48 = vsel %vm1126_vm9, %v1226_v47, -1e+30 }
 0x1a1   : > { %v588_v49 = vmul.f32 0.2, %v586_v46  ;;  %v1228_v50 = vsel %vm591_vm11, %v3084_v48, -inf  ;;  %vm587_vm13 = vcmp.ge.f32.partialorder %v586_v46, 0.0  ;;  %v1545_v41 = vsel %vm571_vm1, %v1520_v5, %v1516_v63 }
 0x1a2   : > { %1229 = vmax.xlane.f32.xlu0 %v1228_v50  ;;  %v853_v51 = vpop.xlane.xlu0 %852 }
 0x1a3   : > { %v589_v52 = vsel %vm587_vm13, %v586_v46, %v588_v49  ;;  %v888_v19 = vrot.slane %v853_v51, %v2992_v23 }
 0x1a4   : > { %v3091_v53 = vsel %vm480_vm12, %v589_v52, -1e+30 }
 0x1a5   : > { %v592_v55 = vsel %vm591_vm11, %v3091_v53, -inf  ;;  %v910_v27 = vsel %vm573_vm2, %v888_v19, %v909_v6 }
 0x1a6   : > { %593 = vmax.xlane.f32.xlu1 %v592_v55  ;;  %v1489_v56 = vpop.xlane.xlu0 %1488 }
 0x1a7   : > { %v1524_v15 = vrot.slane %v1489_v56, %v2992_v23 }
 0x1a9   : > { %v1546_v45 = vsel %vm573_vm2, %v1524_v15, %v1545_v41 }
 0x1aa   : > { %v856_v59 = vpop.xlane.xlu0 %855 }
 0x1ab   : > { %v892_v21 = vrot.slane %v856_v59, %v2992_v23 }
 0x1ad   : > { %v911_v30 = vsel %vm575_vm3, %v892_v21, %v910_v27 }
 0x1ae   : > { %v1492_v60 = vpop.xlane.xlu0 %1491 }
 0x1af   : > { %v1528_v34 = vrot.slane %v1492_v60, %v2992_v23 }
 0x1b1   : > { %v1547_v47 = vsel %vm575_vm3, %v1528_v34, %v1546_v45 }
 0x1b2   : > { %v859_v2 = vpop.xlane.xlu0 %858  ;;  %v868_v29 = vpop.xlane.xlu1 %867 }
 0x1b3   : > { %v896_v13 = vrot.slane %v859_v2, %v2992_v23  ;;  %v908_v9 = vrot.slane %v868_v29, %v2992_v23 }
 0x1b5   : > { %v912_v31 = vsel %vm577_vm4, %v896_v13, %v911_v30 }
 0x1b6   : > { %v1495_v4 = vpop.xlane.xlu0 %1494  ;;  %v796_v36 = vpop.xlane.xlu1 %795 }
 0x1b7   : > { %v1532_v35 = vrot.slane %v1495_v4, %v2992_v23 }
 0x1b9   : > { %v1548_v50 = vsel %vm577_vm4, %v1532_v35, %v1547_v47 }
 0x1ba   : > { %v862_v8 = vpop.xlane.xlu0 %861 }
 0x1bb   : > { %v900_v26 = vrot.slane %v862_v8, %v2992_v23 }
 0x1bd   : > { %v913_v32 = vsel %vm579_vm6, %v900_v26, %v912_v31 }
 0x1be   : > { %v1498_v24 = vpop.xlane.xlu0 %1497 }
 0x1bf   : > { %v1536_v42 = vrot.slane %v1498_v24, %v2992_v23 }
 0x1c1   : > { %v1549_v52 = vsel %vm579_vm6, %v1536_v42, %v1548_v50 }
 0x1c2   : > { %v865_v14 = vpop.xlane.xlu0 %864 }
 0x1c3   : > { %v904_v7 = vrot.slane %v865_v14, %v2992_v23 }
 0x1c5   : > { %v914_v0 = vsel %vm581_vm7, %v904_v7, %v913_v32 }
 0x1c6   : > { %v915_v39 = vsel %vm583_vm8, %v908_v9, %v914_v0  ;;  %v1501_v40 = vpop.xlane.xlu0 %1500 }
 0x1c7   : > { %v917_v44 = vadd.f32 %v915_v39, %v796_v36  ;;  %v1540_v46 = vrot.slane %v1501_v40, %v2992_v23 }
 0x1c9   : > { %vm918_vm14 = vcmp.ge.f32.partialorder %v917_v44, 0.0  ;;  %v919_v49 = vmul.f32 0.2, %v917_v44  ;;  %v1550_v60 = vsel %vm581_vm7, %v1540_v46, %v1549_v52 }
 0x1ca   : > { %v1504_v51 = vpop.xlane.xlu0 %1503 }
 0x1cb   : > { %v1544_v55 = vrot.slane %v1504_v51, %v2992_v23  ;;  %v920_v56 = vsel %vm918_vm14, %v917_v44, %v919_v49 }
 0x1cc   : > { %v921_v59 = vsel %vm480_vm12, %v920_v56, -1e+30 }
 0x1cd   : > { %v922_v2 = vsel %vm591_vm11, %v921_v59, -inf  ;;  %v1551_v4 = vsel %vm583_vm8, %v1544_v55, %v1550_v60  ;;  %v627_v55 = vsub.s32 3, %v2831_v1 }
 0x1ce   : > { %923 = vmax.xlane.f32.xlu1 %v922_v2  ;;  %v1432_v8 = vpop.xlane.xlu0 %1431 }
 0x1cf   : > { %v1553_v10 = vadd.f32 %v1551_v4, %v1432_v8  ;;  %v634_v4 = vsub.s32 4, %v2831_v1 }
 0x1d1   : > { %v1555_v18 = vmul.f32 0.2, %v1553_v10  ;;  %vm1554_vm15 = vcmp.ge.f32.partialorder %v1553_v10, 0.0 }
 0x1d3   : > { %v1556_v19 = vsel %vm1554_vm15, %v1553_v10, %v1555_v18  ;;  %v641_v18 = vsub.s32 5, %v2831_v1 }
 0x1d4   : > { %v1557_v21 = vsel %vm1126_vm9, %v1556_v19, -1e+30 }
 0x1d5   : > { %v1558_v23 = vsel %vm591_vm11, %v1557_v21, -inf }
 0x1d6   : > { %1559 = vmax.xlane.f32.xlu0 %v1558_v23 }
 0x22f   : > { %v1230_v24 = vpop.xlane.xlu0 %1229 }
 0x230   : > { %v1231_v13 = vsub.f32 %v3084_v48, %v1230_v24  ;;  %v648_v24 = vsub.s32 6, %v2831_v1 }
 0x232   : > { %v1232_v6 = vmul.f32 1.442695, %v1231_v13 }
 0x233   : > { %v594_v26 = vpop.xlane.xlu1 %593 }
 0x234   : > { %2476 = vpow2.f32 %v1232_v6  ;;  %v595_v27 = vsub.f32 %v3091_v53, %v594_v26 }
 0x236   : > { %v596_v29 = vmul.f32 1.442695, %v595_v27 }
 0x238   : > { %2478 = vpow2.f32 %v596_v29 }
 0x23e   : > { %v2477_v30 = vpop.eup %2476 }
 0x23f   : > { %v1234_v14 = vsel %vm1126_vm9, %v2477_v30, 0.0  ;;  %v655_v30 = vsub.s32 7, %v2831_v1 }
 0x240   : > { %v1235_v63 = vsel %vm591_vm11, %v1234_v14, 0.0 }
 0x241   : > { %1236 = vadd.xlane.f32.xlu0 %v1235_v63 }
 0x242   : > { %v2479_v5 = vpop.eup %2478 }
 0x243   : > { %v598_v31 = vsel %vm480_vm12, %v2479_v5, 0.0 }
 0x244   : > { %v599_v48 = vsel %vm591_vm11, %v598_v31, 0.0 }
 0x245   : > { %600 = vadd.xlane.f32.xlu1 %v599_v48 }
 0x25b   : > { %v924_v7 = vpop.xlane.xlu1 %923 }
 0x25c   : > { %v925_v15 = vsub.f32 %v921_v59, %v924_v7 }
 0x25e   : > { %v926_v9 = vmul.f32 1.442695, %v925_v15 }
 0x260   : > { %2480 = vpow2.f32 %v926_v9 }
 0x263   : > { %v1560_v53 = vpop.xlane.xlu0 %1559 }
 0x264   : > { %v1561_v32 = vsub.f32 %v1557_v21, %v1560_v53 }
 0x266   : > { %v1562_v34 = vmul.f32 1.442695, %v1561_v32 }
 0x268   : > { %2482 = vpow2.f32 %v1562_v34 }
 0x26a   : > { %v2481_v0 = vpop.eup %2480 }
 0x26b   : > { %v928_v35 = vsel %vm480_vm12, %v2481_v0, 0.0 }
 0x26c   : > { %v929_v36 = vsel %vm591_vm11, %v928_v35, 0.0 }
 0x26d   : > { %930 = vadd.xlane.f32.xlu1 %v929_v36 }
 0x272   : > { %v2483_v39 = vpop.eup %2482 }
 0x273   : > { %v1564_v40 = vsel %vm1126_vm9, %v2483_v39, 0.0  ;;  %vm3704_vm9 = vmmov 0  }
 0x274   : > { %v1565_v41 = vsel %vm591_vm11, %v1564_v40, 0.0  ;;  %vm998_vm11 = vcmask 519424  }
 0x275   : > { %1566 = vadd.xlane.f32.xlu0 %v1565_v41 }
 0x2ce   : > { %v1237_v42 = vpop.xlane.xlu0 %1236 }
 0x2cf   : > { %2484 = vrcp.f32 %v1237_v42 }
 0x2d2   : > { %v601_v44 = vpop.xlane.xlu1 %600 }
 0x2d3   : > { %2486 = vrcp.f32 %v601_v44 }
 0x2d9   : > { %v2485_v45 = vpop.eup %2484 }
 0x2da   : > { %v1239_v49 = vmul.f32 %v2485_v45, %v1234_v14 }
 0x2dc   : > { %v1243_v52 = vrot.slane %v1239_v49, %v2861_v11  ;;  %v1250_v59 = vrot.slane %v1239_v49, %v2837_v3  ;;  %v1264_v60 = vrot.slane %v1239_v49, %v627_v55  ;;  %v1257_v2 = vrot.slane %v1239_v49, %v620_v38 }
 0x2dd   : > { %v2487_v46 = vpop.eup %2486  ;;  %v1271_v10 = vrot.slane %v1239_v49, %v634_v4  ;;  %v1278_v23 = vrot.slane %v1239_v49, %v641_v18  ;;  %v1285_v26 = vrot.slane %v1239_v49, %v648_v24  ;;  %v1292_v53 = vrot.slane %v1239_v49, %v655_v30 }
 0x2de   : > { %v603_v47 = vmul.f32 %v2487_v46, %v598_v31 }
 0x2e0   : > { %v607_v43 = vrot.slane %v603_v47, %v2861_v11  ;;  %v614_v50 = vrot.slane %v603_v47, %v2837_v3  ;;  %v621_v51 = vrot.slane %v603_v47, %v620_v38  ;;  %v628_v56 = vrot.slane %v603_v47, %v627_v55 }
 0x2e1   : > { %v635_v8 = vrot.slane %v603_v47, %v634_v4  ;;  %v642_v19 = vrot.slane %v603_v47, %v641_v18  ;;  %v649_v13 = vrot.slane %v603_v47, %v648_v24  ;;  %v656_v14 = vrot.slane %v603_v47, %v655_v30 }
 0x2e2   : > { %609 = vbcast.lane.b32.xlu1 %v607_v43, 256  ;;  %616 = vbcast.lane.b32.xlu0 %v614_v50, 256 }
 0x2e6   : > { %623 = vbcast.lane.b32.xlu0 %v621_v51, 256  ;;  %1245 = vbcast.lane.b32.xlu1 %v1243_v52, 256  ;;  %v1750_v52 = vld [vmem:[%s3722_s5] sm:$0xff] }
 0x2ea   : > { %630 = vbcast.lane.b32.xlu0 %v628_v56, 256  ;;  %1252 = vbcast.lane.b32.xlu1 %v1250_v59, 256  ;;  %v2708_v59 = vmov 0.0  }
 0x2eb   : > { %2359 = vmatprep.subr.bf16.mxu1 %v2708_v59  ;;  %2367 = vmatprep.mubr.msk.bf16.mxu1 %vm3704_vm9, %v2708_v59 }
 0x2ec   : > { %2379 = vmatprep.mubr.msk.f32.mxu0 %vm3704_vm9, %v2708_v59 }
 0x2ee   : > { %1266 = vbcast.lane.b32.xlu0 %v1264_v60, 256  ;;  %1259 = vbcast.lane.b32.xlu1 %v1257_v2, 256  ;;  %v1752_v60 = vld [vmem:[%s3722_s5 + $0x10] sm:$0xff]  ;;  %v1753_v2 = vld [vmem:[%s3722_s5 + $0x18] sm:$0xff] }
 0x2f2   : > { %637 = vbcast.lane.b32.xlu0 %v635_v8, 256 }
 0x2f6   : > { %1273 = vbcast.lane.b32.xlu0 %v1271_v10, 256 }
 0x2fa   : > { %v931_v21 = vpop.xlane.xlu1 %930  ;;  %644 = vbcast.lane.b32.xlu0 %v642_v19, 256 }
 0x2fb   : > { %2488 = vrcp.f32 %v931_v21 }
 0x2fe   : > { %1280 = vbcast.lane.b32.xlu0 %v1278_v23, 256  ;;  %v1754_v23 = vld [vmem:[%s3722_s5 + $0x20] sm:$0xff] }
 0x302   : > { %651 = vbcast.lane.b32.xlu0 %v649_v13, 256  ;;  %v1567_v6 = vpop.xlane.xlu0 %1566 }
 0x303   : > { %2490 = vrcp.f32 %v1567_v6 }
 0x305   : > { %v2489_v27 = vpop.eup %2488 }
 0x306   : > { %v933_v29 = vmul.f32 %v2489_v27, %v928_v35  ;;  %1287 = vbcast.lane.b32.xlu0 %v1285_v26, 256 }
 0x308   : > { %v937_v63 = vrot.slane %v933_v29, %v2861_v11  ;;  %v944_v5 = vrot.slane %v933_v29, %v2837_v3  ;;  %v951_v9 = vrot.slane %v933_v29, %v620_v38  ;;  %v986_v32 = vrot.slane %v933_v29, %v655_v30 }
 0x309   : > { %v958_v34 = vrot.slane %v933_v29, %v627_v55  ;;  %v965_v35 = vrot.slane %v933_v29, %v634_v4  ;;  %v979_v39 = vrot.slane %v933_v29, %v648_v24 }
 0x30a   : > { %658 = vbcast.lane.b32.xlu0 %v656_v14, 256  ;;  %939 = vbcast.lane.b32.xlu1 %v937_v63, 256 }
 0x30d   : > { %v2491_v31 = vpop.eup %2490 }
 0x30e   : > { %v1569_v48 = vmul.f32 %v2491_v31, %v1564_v40  ;;  %946 = vbcast.lane.b32.xlu0 %v944_v5, 256 }
 0x310   : > { %v1580_v7 = vrot.slane %v1569_v48, %v2837_v3  ;;  %v1573_v15 = vrot.slane %v1569_v48, %v2861_v11  ;;  %v1587_v1 = vrot.slane %v1569_v48, %v620_v38  ;;  %v1594_v0 = vrot.slane %v1569_v48, %v627_v55  ;;  %v1751_v55 = vld [vmem:[%s3722_s5 + $0x8] sm:$0xff] }
 0x311   : > { %v1601_v36 = vrot.slane %v1569_v48, %v634_v4  ;;  %v972_v3 = vrot.slane %v933_v29, %v641_v18  ;;  %v1608_v11 = vrot.slane %v1569_v48, %v641_v18  ;;  %v1615_v40 = vrot.slane %v1569_v48, %v648_v24  ;;  %v1755_v24 = vld [vmem:[%s3722_s5 + $0x28] sm:$0xff] }
 0x312   : > { %1582 = vbcast.lane.b32.xlu1 %v1580_v7, 256  ;;  %1575 = vbcast.lane.b32.xlu0 %v1573_v15, 256  ;;  %v1622_v41 = vrot.slane %v1569_v48, %v655_v30  ;;  %v1758_v56 = vpack.c.bf16 %v1751_v55, %v1750_v52  ;;  %v1760_v14 = vpack.c.bf16 %v1755_v24, %v1754_v23  ;;  %v1756_v7 = vld [vmem:[%s3722_s5 + $0x30] sm:$0xff] }
 0x314   : > { %2360 = vmatpush3.bf16.msra.mxu1 %v1758_v56 }
 0x315   : > { %2361 = vmatprep.subr.bf16.mxu1 %v2708_v59 }
 0x316   : > { %953 = vbcast.lane.b32.xlu1 %v951_v9, 256  ;;  %1294 = vbcast.lane.b32.xlu0 %v1292_v53, 256 }
 0x31a   : > { %1589 = vbcast.lane.b32.xlu1 %v1587_v1, 256  ;;  %988 = vbcast.lane.b32.xlu0 %v986_v32, 256 }
 0x31e   : > { %960 = vbcast.lane.b32.xlu1 %v958_v34, 256 }
 0x322   : > { %1596 = vbcast.lane.b32.xlu1 %v1594_v0, 256 }
 0x326   : > { %967 = vbcast.lane.b32.xlu1 %v965_v35, 256 }
 0x32a   : > { %1603 = vbcast.lane.b32.xlu1 %v1601_v36, 256 }
 0x32e   : > { %974 = vbcast.lane.b32.xlu1 %v972_v3, 256 }
 0x332   : > { %1610 = vbcast.lane.b32.xlu1 %v1608_v11, 256 }
 0x336   : > { %981 = vbcast.lane.b32.xlu1 %v979_v39, 256 }
 0x33a   : > { %1617 = vbcast.lane.b32.xlu1 %v1615_v40, 256 }
 0x33e   : > { %1624 = vbcast.lane.b32.xlu1 %v1622_v41, 256 }
 0x354   : > { %v610_v42 = vpop.permute.xlu1 %609  ;;  %v617_v44 = vpop.permute.xlu0 %616 }
 0x355   : > { %v660_v45 = vmul.f32 %v610_v42, %v2869_v12  ;;  %v661_v46 = vmul.f32 %v617_v44, %v2883_v17 }
 0x357   : > { %v668_v47 = vsel %vm504_vm0, %v660_v45, 0.0  ;;  %v675_v49 = vsel %vm504_vm0, %v661_v46, 0.0 }
 0x358   : > { %v669_v43 = vrot.slane %v668_v47, 4  ;;  %v676_v50 = vrot.slane %v675_v49, 4  ;;  %v1246_v38 = vpop.permute.xlu1 %1245  ;;  %v624_v51 = vpop.permute.xlu0 %623 }
 0x359   : > { %v1296_v12 = vmul.f32 %v2880_v16, %v1246_v38  ;;  %v662_v17 = vmul.f32 %v624_v51, %v2894_v22  ;;  %v1759_v16 = vpack.c.bf16 %v1753_v2, %v1752_v60 }
 0x35a   : > { %v670_v4 = vadd.f32 %v669_v43, %v668_v47  ;;  %v677_v22 = vadd.f32 %v676_v50, %v675_v49 }
 0x35b   : > { %v1304_v8 = vsel %vm504_vm0, %v1296_v12, 0.0  ;;  %v682_v10 = vsel %vm504_vm0, %v662_v17, 0.0  ;;  %2362 = vmatpush3.bf16.msra.mxu1 %v1759_v16 }
 0x35c   : > { %v1305_v18 = vrot.slane %v1304_v8, 4  ;;  %v1253_v19 = vpop.permute.xlu1 %1252  ;;  %v631_v21 = vpop.permute.xlu0 %630  ;;  %v683_v13 = vrot.slane %v682_v10, 4  ;;  %v671_v27 = vrot.slane %v670_v4, 2  ;;  %v678_v63 = vrot.slane %v677_v22, 2  ;;  %2363 = vmatprep.subr.bf16.mxu1 %v2708_v59 }
 0x35d   : > { %v1297_v6 = vmul.f32 %v2889_v20, %v1253_v19  ;;  %v663_v26 = vmul.f32 %v631_v21, %v2906_v28  ;;  %v1757_v20 = vld [vmem:[%s3722_s5 + $0x38] sm:$0xff] }
 0x35e   : > { %v1306_v5 = vadd.f32 %v1305_v18, %v1304_v8  ;;  %v684_v28 = vadd.f32 %v683_v13, %v682_v10  ;;  %v672_v32 = vadd.f32 %v671_v27, %v670_v4  ;;  %v1761_v0 = vpack.c.bf16 %v1757_v20, %v1756_v7 }
 0x35f   : > { %v1311_v29 = vsel %vm504_vm0, %v1297_v6, 0.0  ;;  %v689_v30 = vsel %vm504_vm0, %v663_v26, 0.0  ;;  %2364 = vmatpush3.bf16.msra.mxu1 %v1760_v14  ;;  %v679_v35 = vadd.f32 %v678_v63, %v677_v22 }
 0x360   : > { %v1260_v31 = vpop.permute.xlu1 %1259  ;;  %v1267_v48 = vpop.permute.xlu0 %1266  ;;  %v1312_v53 = vrot.slane %v1311_v29, 4  ;;  %v690_v1 = vrot.slane %v689_v30, 4  ;;  %v1307_v36 = vrot.slane %v1306_v5, 2  ;;  %2365 = vmatprep.subr.bf16.mxu1 %v2708_v59  ;;  %v685_v39 = vrot.slane %v684_v28, 2 }
 0x361   : > { %v1298_v15 = vmul.f32 %v2900_v25, %v1260_v31  ;;  %v1299_v9 = vmul.f32 %v2915_v33, %v1267_v48  ;;  %v673_v42 = vrot.slane %v672_v32, 1  ;;  %v680_v45 = vrot.slane %v679_v35, 1 }
 0x362   : > { %v1313_v40 = vadd.f32 %v1312_v53, %v1311_v29  ;;  %v691_v41 = vadd.f32 %v690_v1, %v689_v30  ;;  %v1308_v46 = vadd.f32 %v1307_v36, %v1306_v5  ;;  %v686_v50 = vadd.f32 %v685_v39, %v684_v28 }
 0x363   : > { %v1318_v34 = vsel %vm504_vm0, %v1298_v15, 0.0  ;;  %v1325_v3 = vsel %vm504_vm0, %v1299_v9, 0.0  ;;  %2366 = vmatpush3.bf16.msra.mxu1 %v1761_v0  ;;  %v3210_v17 = vadd.f32 %v673_v42, %v672_v32  ;;  %v3212_v56 = vadd.f32 %v680_v45, %v679_v35 }
 0x364   : > { %v638_v11 = vpop.permute.xlu0 %637  ;;  %v1319_v25 = vrot.slane %v1318_v34, 4  ;;  %v1326_v44 = vrot.slane %v1325_v3, 4  ;;  %v1314_v38 = vrot.slane %v1313_v40, 2  ;;  %v692_v51 = vrot.slane %v691_v41, 2 }
 0x365   : > { %v664_v33 = vmul.f32 %v638_v11, %v2922_v37  ;;  %v1309_v37 = vrot.slane %v1308_v46, 1  ;;  %v687_v4 = vrot.slane %v686_v50, 1  ;;  %v732_v23 = vmul.f32 1.442695, %v3210_v17 }
 0x366   : > { %v1320_v47 = vadd.f32 %v1319_v25, %v1318_v34  ;;  %v1327_v52 = vadd.f32 %v1326_v44, %v1325_v3  ;;  %v1315_v22 = vadd.f32 %v1314_v38, %v1313_v40  ;;  %v693_v18 = vadd.f32 %v692_v51, %v691_v41 }
 0x367   : > { %v696_v49 = vsel %vm504_vm0, %v664_v33, 0.0  ;;  %v734_v6 = vmul.f32 1.442695, %v3212_v56  ;;  %v3219_v26 = vadd.f32 %v1309_v37, %v1308_v46  ;;  %v3221_v27 = vadd.f32 %v687_v4, %v686_v50 }
 0x368   : > { %v1274_v43 = vpop.permute.xlu0 %1273  ;;  %v697_v55 = vrot.slane %v696_v49, 4  ;;  %v1321_v60 = vrot.slane %v1320_v47, 2  ;;  %v1328_v19 = vrot.slane %v1327_v52, 2  ;;  %v1316_v30 = vrot.slane %v1315_v22, 1 }
 0x369   : > { %v1300_v12 = vmul.f32 %v2955_v54, %v1274_v43  ;;  %v694_v14 = vrot.slane %v693_v18, 1  ;;  %2492 = vpow2.f32 %v732_v23  ;;  %v1368_v9 = vmul.f32 1.442695, %v3219_v26 }
 0x36a   : > { %v698_v8 = vadd.f32 %v697_v55, %v696_v49  ;;  %v1322_v54 = vadd.f32 %v1321_v60, %v1320_v47  ;;  %v1329_v5 = vadd.f32 %v1328_v19, %v1327_v52  ;;  %2494 = vpow2.f32 %v734_v6 }
 0x36b   : > { %v1332_v10 = vsel %vm504_vm0, %v1300_v12, 0.0  ;;  %v736_v53 = vmul.f32 1.442695, %v3221_v27  ;;  %v3226_v1 = vadd.f32 %v1316_v30, %v1315_v22  ;;  %v3228_v32 = vadd.f32 %v694_v14, %v693_v18  ;;  %v3251_v18 = vld [vmem:[%s2866_s20 + $0x1c] sm:$0xf] }
 0x36c   : > { %v645_v2 = vpop.permute.xlu0 %644  ;;  %v1333_v21 = vrot.slane %v1332_v10, 4  ;;  %v699_v29 = vrot.slane %v698_v8, 2  ;;  %v1323_v31 = vrot.slane %v1322_v54, 1  ;;  %v1330_v34 = vrot.slane %v1329_v5, 1 }
 0x36d   : > { %v665_v16 = vmul.f32 %v645_v2, %v2965_v58  ;;  %2496 = vpow2.f32 %v1368_v9  ;;  %v1370_v33 = vmul.f32 1.442695, %v3226_v1  ;;  %v738_v44 = vmul.f32 1.442695, %v3228_v32 }
 0x36e   : > { %v1334_v58 = vadd.f32 %v1333_v21, %v1332_v10  ;;  %v700_v20 = vadd.f32 %v699_v29, %v698_v8  ;;  %v3232_v3 = vadd.f32 %v1323_v31, %v1322_v54  ;;  %2498 = vpow2.f32 %v736_v53 }
 0x36f   : > { %v703_v24 = vsel %vm504_vm0, %v665_v16, 0.0  ;;  %v3237_v45 = vadd.f32 %v1330_v34, %v1329_v5  ;;  %2500 = vpow2.f32 %v1370_v33  ;;  %vm724_vm10 = vcmp.gt.f32.partialorder %v3210_v17, 0.0  ;;  %v2569_v33 = vld [vmem:[%s2866_s20 + $0x24] sm:$0xf] }
 0x370   : > { %v1281_v13 = vpop.permute.xlu0 %1280  ;;  %v704_v63 = vrot.slane %v703_v24, 4  ;;  %v1335_v48 = vrot.slane %v1334_v58, 2  ;;  %v701_v40 = vrot.slane %v700_v20, 1  ;;  %v1372_v46 = vmul.f32 1.442695, %v3232_v3 }
 0x371   : > { %v1301_v15 = vmul.f32 %v2962_v57, %v1281_v13  ;;  %2502 = vpow2.f32 %v738_v44  ;;  %v1374_v60 = vmul.f32 1.442695, %v3237_v45  ;;  %vm725_vm12 = vcmp.gt.f32.partialorder %v3212_v56, 0.0 }
 0x372   : > { %v705_v28 = vadd.f32 %v704_v63, %v703_v24  ;;  %v1336_v11 = vadd.f32 %v1335_v48, %v1334_v58  ;;  %v3241_v50 = vadd.f32 %v701_v40, %v700_v20  ;;  %2504 = vpow2.f32 %v1372_v46  ;;  %v2567_v20 = vld [vmem:[%s2866_s20] sm:$0xf] }
 0x373   : > { %v1339_v35 = vsel %vm504_vm0, %v1301_v15, 0.0  ;;  %v2493_v55 = vpop.eup %2492  ;;  %2506 = vpow2.f32 %v1374_v60  ;;  %vm1360_vm13 = vcmp.gt.f32.partialorder %v3219_v26, 0.0  ;;  %vm726_vm14 = vcmp.gt.f32.partialorder %v3221_v27, 0.0 }
 0x374   : > { %v652_v7 = vpop.permute.xlu0 %651  ;;  %v706_v0 = vrot.slane %v705_v28, 2  ;;  %v1340_v41 = vrot.slane %v1339_v35, 4  ;;  %v1337_v47 = vrot.slane %v1336_v11, 1  ;;  %v2495_v37 = vpop.eup %2494  ;;  %v740_v10 = vmul.f32 1.442695, %v3241_v50 }
 0x375   : > { %v666_v36 = vmul.f32 %v652_v7, %v2975_v62  ;;  %v2279_v24 = vadd.f32 -1.0, %v2493_v55  ;;  %v2280_v13 = vadd.f32 -1.0, %v2495_v37  ;;  %vm1361_vm15 = vcmp.gt.f32.partialorder %v3226_v1, 0.0 }
 0x376   : > { %v707_v57 = vadd.f32 %v706_v0, %v705_v28  ;;  %v1341_v51 = vadd.f32 %v1340_v41, %v1339_v35  ;;  %2508 = vpow2.f32 %v740_v10  ;;  %vm727_vm9 = vcmp.gt.f32.partialorder %v3228_v32, 0.0  ;;  %v2568_v0 = vld [vmem:[%s2866_s20 + $0x4] sm:$0xf] }
 0x377   : > { %v710_v25 = vsel %vm504_vm0, %v666_v36, 0.0  ;;  %v2497_v6 = vpop.eup %2496  ;;  %v756_v9 = vsel %vm724_vm10, %v3210_v17, %v2279_v24  ;;  %vm1362_vm10 = vcmp.gt.f32.partialorder %v3232_v3, 0.0 }
 0x378   : > { %v1288_v39 = vpop.permute.xlu0 %1287  ;;  %v711_v42 = vrot.slane %v710_v25, 4  ;;  %v708_v38 = vrot.slane %v707_v57, 1  ;;  %v1342_v22 = vrot.slane %v1341_v51, 2  ;;  %v2499_v5 = vpop.eup %2498  ;;  %v2307_v53 = vadd.f32 -1.0, %v2497_v6 }
 0x379   : > { %v1302_v62 = vmul.f32 %v2972_v61, %v1288_v39  ;;  %v3245_v61 = vadd.f32 %v1337_v47, %v1336_v11  ;;  %v2501_v11 = vpop.eup %2500  ;;  %v757_v39 = vsel %vm725_vm12, %v3212_v56, %v2280_v13  ;;  %v2281_v40 = vadd.f32 -1.0, %v2499_v5 }
 0x37a   : > { %v712_v49 = vadd.f32 %v711_v42, %v710_v25  ;;  %v3248_v16 = vadd.f32 %v708_v38, %v707_v57  ;;  %v1343_v48 = vadd.f32 %v1342_v22, %v1341_v51  ;;  %v772_v56 = vsel %vm571_vm1, %v757_v39, %v756_v9  ;;  %v2571_v22 = vld [vmem:[%s2866_s20 + $0x8] sm:$0xf] }
 0x37b   : > { %v1346_v52 = vsel %vm504_vm0, %v1302_v62, 0.0  ;;  %v1376_v29 = vmul.f32 1.442695, %v3245_v61  ;;  %v2503_v41 = vpop.eup %2502  ;;  %v1392_v38 = vsel %vm1360_vm13, %v3219_v26, %v2307_v53  ;;  %v2308_v55 = vadd.f32 -1.0, %v2501_v11  ;;  %v2573_v11 = vld [vmem:[%s2866_s20 + $0x28] sm:$0xf] }
 0x37c   : > { %v659_v43 = vpop.permute.xlu0 %658  ;;  %v713_v12 = vrot.slane %v712_v49, 2  ;;  %v1347_v4 = vrot.slane %v1346_v52, 4  ;;  %v940_v8 = vpop.permute.xlu1 %939  ;;  %v742_v31 = vmul.f32 1.442695, %v3248_v16  ;;  %v1344_v25 = vrot.slane %v1343_v48, 1 }
 0x37d   : > { %v667_v19 = vmul.f32 %v3251_v18, %v659_v43  ;;  %v990_v28 = vmul.f32 %v2567_v20, %v940_v8  ;;  %2510 = vpow2.f32 %v1376_v29  ;;  %v2505_v44 = vpop.eup %2504  ;;  %vm1363_vm12 = vcmp.gt.f32.partialorder %v3237_v45, 0.0 }
 0x37e   : > { %v714_v2 = vadd.f32 %v713_v12, %v712_v49  ;;  %v1348_v54 = vadd.f32 %v1347_v4, %v1346_v52  ;;  %2512 = vpow2.f32 %v742_v31  ;;  %v2570_v49 = vld [vmem:[%s2866_s20 + $0x20] sm:$0xf]  ;;  %v758_v52 = vsel %vm726_vm14, %v3221_v27, %v2281_v40 }
 0x37f   : > { %v717_v58 = vsel %vm504_vm0, %v667_v19, 0.0  ;;  %v999_v46 = vsel %vm998_vm11, %v990_v28, 0.0  ;;  %v2282_v12 = vadd.f32 -1.0, %v2503_v41  ;;  %v2309_v4 = vadd.f32 -1.0, %v2505_v44 }
 0x380   : > { %v947_v21 = vpop.permute.xlu0 %946  ;;  %v715_v23 = vrot.slane %v714_v2, 1  ;;  %v1349_v14 = vrot.slane %v1348_v54, 2  ;;  %v718_v15 = vrot.slane %v717_v58, 4  ;;  %v1000_v8 = vrot.slane %v999_v46, 4 }
 0x381   : > { %v991_v35 = vmul.f32 %v2568_v0, %v947_v21  ;;  %v3289_v19 = vadd.f32 %v1344_v25, %v1343_v48  ;;  %v773_v24 = vsel %vm573_vm2, %v758_v52, %v772_v56  ;;  %vm728_vm13 = vcmp.gt.f32.partialorder %v3241_v50, 0.0 }
 0x382   : > { %v3257_v30 = vadd.f32 %v715_v23, %v714_v2  ;;  %v1350_v7 = vadd.f32 %v1349_v14, %v1348_v54  ;;  %v719_v17 = vadd.f32 %v718_v15, %v717_v58  ;;  %v2507_v2 = vpop.eup %2506  ;;  %v1393_v29 = vsel %vm1361_vm15, %v3226_v1, %v2308_v55 }
 0x383   : > { %v1006_v51 = vsel %vm998_vm11, %v991_v35, 0.0  ;;  %v2509_v54 = vpop.eup %2508  ;;  %v759_v14 = vsel %vm727_vm9, %v3228_v32, %v2282_v12  ;;  %v2310_v58 = vadd.f32 -1.0, %v2507_v2  ;;  %v1394_v48 = vsel %vm1362_vm10, %v3232_v3, %v2309_v4 }
 0x384   : > { %v1583_v63 = vpop.permute.xlu1 %1582  ;;  %v744_v34 = vmul.f32 1.442695, %v3257_v30  ;;  %v1576_v36 = vpop.permute.xlu0 %1575  ;;  %v1351_v62 = vrot.slane %v1350_v7, 1  ;;  %v720_v47 = vrot.slane %v719_v17, 2  ;;  %v1007_v23 = vrot.slane %v1006_v51, 4 }
 0x385   : > { %v1627_v42 = vmul.f32 %v2569_v33, %v1583_v63  ;;  %v1626_v43 = vmul.f32 %v2570_v49, %v1576_v36  ;;  %v2283_v15 = vadd.f32 -1.0, %v2509_v54  ;;  %v1378_v32 = vmul.f32 1.442695, %v3289_v19  ;;  %v3315_v36 = vld [vmem:[%s2866_s20 + $0x3c] sm:$0xf] }
 0x386   : > { %2514 = vpow2.f32 %v744_v34  ;;  %v721_v10 = vadd.f32 %v720_v47, %v719_v17  ;;  %v3291_v21 = vadd.f32 %v1351_v62, %v1350_v7  ;;  %v1001_v7 = vadd.f32 %v1000_v8, %v999_v46 }
 0x387   : > { %v1641_v37 = vsel %vm998_vm11, %v1627_v42, 0.0  ;;  %v1634_v27 = vsel %vm998_vm11, %v1626_v43, 0.0  ;;  %v2511_v28 = vpop.eup %2510  ;;  %v1008_v53 = vadd.f32 %v1007_v23, %v1006_v51  ;;  %vm1364_vm9 = vcmp.gt.f32.partialorder %v3245_v61, 0.0 }
 0x388   : > { %v954_v57 = vpop.permute.xlu1 %953  ;;  %v722_v13 = vrot.slane %v721_v10, 1  ;;  %v1642_v6 = vrot.slane %v1641_v37, 4  ;;  %v1635_v63 = vrot.slane %v1634_v27, 4  ;;  %v1295_v5 = vpop.permute.xlu0 %1294  ;;  %v1380_v9 = vmul.f32 1.442695, %v3291_v21 }
 0x389   : > { %v992_v26 = vmul.f32 %v2571_v22, %v954_v57  ;;  %v2513_v34 = vpop.eup %2512  ;;  %v1303_v3 = vmul.f32 %v3315_v36, %v1295_v5  ;;  %v1408_v40 = vsel %vm571_vm1, %v1393_v29, %v1392_v38  ;;  %v774_v17 = vsel %vm575_vm3, %v759_v14, %v773_v24 }
 0x38a   : > { %v3307_v20 = vadd.f32 %v722_v13, %v721_v10  ;;  %v1643_v35 = vadd.f32 %v1642_v6, %v1641_v37  ;;  %v1636_v57 = vadd.f32 %v1635_v63, %v1634_v27  ;;  %v1409_v42 = vsel %vm573_vm2, %v1394_v48, %v1408_v40  ;;  %v2574_v48 = vld [vmem:[%s2866_s20 + $0xc] sm:$0xf] }
 0x38b   : > { %v1013_v1 = vsel %vm998_vm11, %v992_v26, 0.0  ;;  %v1395_v44 = vsel %vm1363_vm12, %v3237_v45, %v2310_v58  ;;  %v1002_v62 = vrot.slane %v1001_v7, 2  ;;  %v760_v46 = vsel %vm728_vm13, %v3241_v50, %v2283_v15  ;;  %v2575_v15 = vld [vmem:[%s2866_s20 + $0x2c] sm:$0xf] }
 0x38c   : > { %v1590_v60 = vpop.permute.xlu1 %1589  ;;  %v746_v0 = vmul.f32 1.442695, %v3307_v20  ;;  %v1014_v41 = vrot.slane %v1013_v1, 4  ;;  %v2284_v47 = vadd.f32 -1.0, %v2513_v34  ;;  %v1009_v49 = vrot.slane %v1008_v53, 2  ;;  %v989_v51 = vpop.permute.xlu0 %988 }
 0x38d   : > { %v1628_v39 = vmul.f32 %v2573_v11, %v1590_v60  ;;  %v1644_v43 = vrot.slane %v1643_v35, 2  ;;  %v1353_v56 = vsel %vm504_vm0, %v1303_v3, 0.0  ;;  %v2311_v52 = vadd.f32 -1.0, %v2511_v28 }
 0x38e   : > { %2516 = vpow2.f32 %v746_v0  ;;  %v1637_v12 = vrot.slane %v1636_v57, 2  ;;  %v1015_v45 = vadd.f32 %v1014_v41, %v1013_v1  ;;  %v3331_v60 = vsel %vm575_vm3, %v1395_v44, %v1409_v42 }
 0x38f   : > { %2518 = vpow2.f32 %v1378_v32  ;;  %v1648_v38 = vsel %vm998_vm11, %v1628_v39, 0.0  ;;  %vm729_vm14 = vcmp.gt.f32.partialorder %v3248_v16, 0.0  ;;  %v1003_v50 = vadd.f32 %v1002_v62, %v1001_v7 }
 0x390   : > { %v3302_v31 = vpop.permute.xlu1 %960  ;;  %v2515_v33 = vpop.eup %2514  ;;  %2520 = vpow2.f32 %v1380_v9  ;;  %v1354_v2 = vrot.slane %v1353_v56, 4  ;;  %v761_v4 = vsel %vm729_vm14, %v3248_v16, %v2284_v47  ;;  %v1010_v8 = vadd.f32 %v1009_v49, %v1008_v53 }
 0x391   : > { %v2285_v55 = vadd.f32 -1.0, %v2515_v33  ;;  %v1649_v10 = vrot.slane %v1648_v38, 4  ;;  %v997_v22 = vmul.f32 %v3251_v18, %v989_v51  ;;  %v775_v26 = vsel %vm577_vm4, %v760_v46, %v774_v17  ;;  %v2576_v33 = vld [vmem:[%s2866_s20 + $0x10] sm:$0xf] }
 0x392   : > { %vm730_vm0 = vcmp.gt.f32.partialorder %v3257_v30, 0.0  ;;  %v1645_v23 = vadd.f32 %v1644_v43, %v1643_v35  ;;  %v1355_v27 = vadd.f32 %v1354_v2, %v1353_v56  ;;  %v3341_v54 = vsel %vm1364_vm9, %v3245_v61, %v2311_v52 }
 0x393   : > { %v762_v24 = vsel %vm730_vm0, %v3257_v30, %v2285_v55  ;;  %v1638_v13 = vadd.f32 %v1637_v12, %v1636_v57  ;;  %v1016_v16 = vrot.slane %v1015_v45, 2  ;;  %v776_v18 = vsel %vm579_vm6, %v761_v4, %v775_v26  ;;  %v2577_v12 = vld [vmem:[%s2866_s20 + $0x30] sm:$0xf] }
 0x394   : > { %v1597_v25 = vpop.permute.xlu1 %1596  ;;  %v1004_v29 = vrot.slane %v1003_v50, 1  ;;  %vm731_vm15 = vcmp.gt.f32.partialorder %v3307_v20, 0.0  ;;  %v1356_v14 = vrot.slane %v1355_v27, 2  ;;  %v1011_v58 = vrot.slane %v1010_v8, 1 }
 0x395   : > { %v1650_v63 = vadd.f32 %v1649_v10, %v1648_v38  ;;  %v1048_v5 = vsel %vm998_vm11, %v997_v22, 0.0  ;;  %v993_v61 = vmul.f32 %v2574_v48, %v3302_v31  ;;  %vm1365_vm10 = vcmp.gt.f32.partialorder %v3289_v19, 0.0 }
 0x396   : > { %v777_v30 = vsel %vm581_vm7, %v762_v24, %v776_v18  ;;  %v1646_v1 = vrot.slane %v1645_v23, 1  ;;  %v1357_v28 = vadd.f32 %v1356_v14, %v1355_v27  ;;  %v1629_v32 = vmul.f32 %v2575_v15, %v1597_v25 }
 0x397   : > { %v1639_v34 = vrot.slane %v1638_v13, 1  ;;  %v1017_v0 = vadd.f32 %v1016_v16, %v1015_v45  ;;  %v1020_v35 = vsel %vm998_vm11, %v993_v61, 0.0  ;;  %v1049_v39 = vrot.slane %v1048_v5, 4 }
 0x398   : > { %v968_v37 = vpop.permute.xlu1 %967  ;;  %v2517_v7 = vpop.eup %2516  ;;  %v1358_v31 = vrot.slane %v1357_v28, 1  ;;  %v1021_v40 = vrot.slane %v1020_v35, 4  ;;  %v1655_v17 = vsel %vm998_vm11, %v1629_v32, 0.0  ;;  %v1651_v41 = vrot.slane %v1650_v63, 2 }
 0x399   : > { %v2519_v9 = vpop.eup %2518  ;;  %v2286_v53 = vadd.f32 -1.0, %v2517_v7  ;;  %v1656_v25 = vrot.slane %v1655_v17, 4  ;;  %v994_v42 = vmul.f32 %v2576_v33, %v968_v37  ;;  %v3360_v44 = vadd.f32 %v1004_v29, %v1003_v50 }
 0x39a   : > { %v2521_v11 = vpop.eup %2520  ;;  %v3363_v46 = vadd.f32 %v1358_v31, %v1357_v28  ;;  %v1022_v47 = vadd.f32 %v1021_v40, %v1020_v35  ;;  %v2312_v49 = vadd.f32 -1.0, %v2519_v9  ;;  %v3366_v56 = vadd.f32 %v1011_v58, %v1010_v8  ;;  %v2579_v35 = vld [vmem:[%s2866_s20 + $0x34] sm:$0xf]  ;;  %v2580_v31 = vld [vmem:[%s2866_s20 + $0x18] sm:$0xf] }
 0x39b   : > { %v763_v57 = vsel %vm731_vm15, %v3307_v20, %v2286_v53  ;;  %v2313_v43 = vadd.f32 -1.0, %v2521_v11  ;;  %v3368_v38 = vadd.f32 %v1646_v1, %v1645_v23  ;;  %v1018_v51 = vrot.slane %v1017_v0, 1  ;;  %v2581_v40 = vld [vmem:[%s2866_s20 + $0x38] sm:$0xf] }
 0x39c   : > { %v1604_v6 = vpop.permute.xlu1 %1603  ;;  %v778_v62 = vsel %vm583_vm8, %v763_v57, %v777_v30  ;;  %v1382_v52 = vmul.f32 1.442695, %v3363_v46  ;;  %v1050_v55 = vadd.f32 %v1049_v39, %v1048_v5  ;;  %v3372_v37 = vadd.f32 %v1639_v34, %v1638_v13  ;;  %v2578_v34 = vld [vmem:[%s2866_s20 + $0x14] sm:$0xf]  ;;  %s2711_s20 = smov 1  }
 0x39d   : > { %780 = vst.msk [vmem:[#allocation2] sm:$0xff] %vm488_vm5, %v778_v62  ;;  %v1630_v45 = vmul.f32 %v2577_v12, %v1604_v6  ;;  %v1652_v50 = vadd.f32 %v1651_v41, %v1650_v63  ;;  %v1657_v2 = vadd.f32 %v1656_v25, %v1655_v17  ;;  %v1027_v4 = vsel %vm998_vm11, %v994_v42, 0.0 }
 0x39e   : > { %vm1366_vm12 = vcmp.gt.f32.partialorder %v3291_v21, 0.0  ;;  %v1063_v8 = vmul.f32 1.442695, %v3360_v44  ;;  %2522 = vpow2.f32 %v1382_v52  ;;  %v1023_v10 = vrot.slane %v1022_v47, 2 }
 0x39f   : > { %v1397_v22 = vsel %vm1365_vm10, %v3289_v19, %v2312_v49  ;;  %v1398_v26 = vsel %vm1366_vm12, %v3291_v21, %v2313_v43  ;;  %v1065_v23 = vmul.f32 1.442695, %v3366_v56  ;;  %v1700_v27 = vmul.f32 1.442695, %v3368_v38 }
 0x3a0   : > { %v3353_v3 = vpop.permute.xlu1 %974  ;;  %v3383_v13 = vadd.f32 %v1018_v51, %v1017_v0  ;;  %v1051_v16 = vrot.slane %v1050_v55, 2  ;;  %v1028_v6 = vrot.slane %v1027_v4, 4  ;;  %v1662_v18 = vsel %vm998_vm11, %v1630_v45, 0.0 }
 0x3a1   : > { %v1698_v29 = vmul.f32 1.442695, %v3372_v37  ;;  %v1653_v14 = vrot.slane %v1652_v50, 1  ;;  %v1658_v58 = vrot.slane %v1657_v2, 2  ;;  %v1663_v63 = vrot.slane %v1662_v18, 4 }
 0x3a2   : > { %v1411_v19 = vsel %vm577_vm4, %v3341_v54, %v3331_v60  ;;  %2524 = vpow2.f32 %v1063_v8  ;;  %v1024_v21 = vadd.f32 %v1023_v10, %v1022_v47  ;;  %v1029_v5 = vadd.f32 %v1028_v6, %v1027_v4 }
 0x3a3   : > { %v1412_v48 = vsel %vm579_vm6, %v1397_v22, %v1411_v19  ;;  %2526 = vpow2.f32 %v1065_v23  ;;  %v1664_v61 = vadd.f32 %v1663_v63, %v1662_v18  ;;  %v1052_v30 = vadd.f32 %v1051_v16, %v1050_v55 }
 0x3a4   : > { %v1611_v20 = vpop.permute.xlu1 %1610  ;;  %v1413_v7 = vsel %vm581_vm7, %v1398_v26, %v1412_v48  ;;  %2528 = vpow2.f32 %v1700_v27  ;;  %v1030_v1 = vrot.slane %v1029_v5, 2  ;;  %v1067_v60 = vmul.f32 1.442695, %v3383_v13 }
 0x3a5   : > { %2530 = vpow2.f32 %v1698_v29  ;;  %v3393_v54 = vadd.f32 %v1653_v14, %v1652_v50  ;;  %v1659_v15 = vadd.f32 %v1658_v58, %v1657_v2  ;;  %v1025_v32 = vrot.slane %v1024_v21, 1 }
 0x3a6   : > { %v1031_v9 = vadd.f32 %v1030_v1, %v1029_v5  ;;  %v1665_v53 = vrot.slane %v1664_v61, 2  ;;  %v995_v0 = vmul.f32 %v2578_v34, %v3353_v3  ;;  %vm1367_vm13 = vcmp.gt.f32.partialorder %v3363_v46, 0.0 }
 0x3a7   : > { %v1631_v11 = vmul.f32 %v2579_v35, %v1611_v20  ;;  %v1053_v41 = vrot.slane %v1052_v30, 1  ;;  %v3404_v43 = vadd.f32 %v1025_v32, %v1024_v21  ;;  %v1660_v51 = vrot.slane %v1659_v15, 1 }
 0x3a8   : > { %v982_v24 = vpop.permute.xlu1 %981  ;;  %v2523_v57 = vpop.eup %2522  ;;  %v1032_v25 = vrot.slane %v1031_v9, 1  ;;  %v1666_v33 = vadd.f32 %v1665_v53, %v1664_v61  ;;  %v1034_v42 = vsel %vm998_vm11, %v995_v0, 0.0  ;;  %2532 = vpow2.f32 %v1067_v60 }
 0x3a9   : > { %v996_v39 = vmul.f32 %v2580_v31, %v982_v24  ;;  %v2314_v62 = vadd.f32 -1.0, %v2523_v57  ;;  %v1035_v47 = vrot.slane %v1034_v42, 4  ;;  %v1669_v49 = vsel %vm998_vm11, %v1631_v11, 0.0 }
 0x3aa   : > { %v3406_v20 = vadd.f32 %v1032_v25, %v1031_v9  ;;  %v1670_v52 = vrot.slane %v1669_v49, 4  ;;  %v3414_v22 = vadd.f32 %v1053_v41, %v1052_v30  ;;  %v1667_v26 = vrot.slane %v1666_v33, 1 }
 0x3ab   : > { %v1041_v3 = vsel %vm998_vm11, %v996_v39, 0.0  ;;  %v1399_v55 = vsel %vm1367_vm13, %v3363_v46, %v2314_v62  ;;  %v1036_v12 = vadd.f32 %v1035_v47, %v1034_v42  ;;  %v1069_v46 = vmul.f32 1.442695, %v3404_v43 }
 0x3ac   : > { %v1618_v28 = vpop.permute.xlu1 %1617  ;;  %v1042_v45 = vrot.slane %v1041_v3, 4  ;;  %v2525_v4 = vpop.eup %2524  ;;  %v1414_v8 = vsel %vm583_vm8, %v1399_v55, %v1413_v7  ;;  %v1671_v27 = vadd.f32 %v1670_v52, %v1669_v49  ;;  %v1702_v14 = vmul.f32 1.442695, %v3393_v54 }
 0x3ad   : > { %v1632_v17 = vmul.f32 %v2581_v40, %v1618_v28  ;;  %v2527_v10 = vpop.eup %2526  ;;  %1416 = vst.msk [vmem:[#allocation2 + $0x8] sm:$0xff] %vm488_vm5, %v1414_v8  ;;  %v1037_v23 = vrot.slane %v1036_v12, 2  ;;  %v3421_v58 = vadd.f32 %v1660_v51, %v1659_v15  ;;  %v1071_v63 = vmul.f32 1.442695, %v3406_v20 }
 0x3ae   : > { %v2529_v24 = vpop.eup %2528  ;;  %v1043_v16 = vadd.f32 %v1042_v45, %v1041_v3  ;;  %v1672_v21 = vrot.slane %v1671_v27, 2  ;;  %v1077_v7 = vmul.f32 1.442695, %v3414_v22  ;;  %v3426_v30 = vadd.f32 %v1667_v26, %v1666_v33 }
 0x3af   : > { %v1676_v50 = vsel %vm998_vm11, %v1632_v17, 0.0  ;;  %v3418_v29 = vpop.eup %2530  ;;  %v1038_v19 = vadd.f32 %v1037_v23, %v1036_v12  ;;  %2534 = vpow2.f32 %v1069_v46  ;;  %v1704_v53 = vmul.f32 1.442695, %v3421_v58 }
 0x3b0   : > { %v1625_v2 = vpop.permute.xlu1 %1624  ;;  %v1677_v6 = vrot.slane %v1676_v50, 4  ;;  %v1044_v5 = vrot.slane %v1043_v16, 2  ;;  %v1673_v28 = vadd.f32 %v1672_v21, %v1671_v27  ;;  %2536 = vpow2.f32 %v1071_v63 }
 0x3b1   : > { %v1633_v18 = vmul.f32 %v3315_v36, %v1625_v2  ;;  %v1039_v1 = vrot.slane %v1038_v19, 1  ;;  %2538 = vpow2.f32 %v1702_v14  ;;  %v1706_v11 = vmul.f32 1.442695, %v3426_v30 }
 0x3b2   : > { %v1678_v48 = vadd.f32 %v1677_v6, %v1676_v50  ;;  %v1045_v60 = vadd.f32 %v1044_v5, %v1043_v16  ;;  %v1674_v34 = vrot.slane %v1673_v28, 1  ;;  %v2533_v39 = vpop.eup %2532  ;;  %2540 = vpow2.f32 %v1077_v7 }
 0x3b3   : > { %v1683_v61 = vsel %vm998_vm11, %v1633_v18, 0.0  ;;  %v3428_v15 = vadd.f32 %v1039_v1, %v1038_v19  ;;  %v2288_v3 = vadd.f32 -1.0, %v2527_v10  ;;  %v2287_v55 = vadd.f32 -1.0, %v2525_v4 }
 0x3b4   : > { %v1684_v36 = vrot.slane %v1683_v61, 4  ;;  %v1679_v32 = vrot.slane %v1678_v48, 2  ;;  %v1046_v0 = vrot.slane %v1045_v60, 1  ;;  %v3433_v40 = vadd.f32 %v1674_v34, %v1673_v28 }
 0x3b5   : > { %v1073_v31 = vmul.f32 1.442695, %v3428_v15  ;;  %vm1055_vm11 = vcmp.gt.f32.partialorder %v3360_v44, 0.0  ;;  %v2289_v12 = vadd.f32 -1.0, %v2533_v39  ;;  %vm1056_vm9 = vcmp.gt.f32.partialorder %v3366_v56, 0.0 }
 0x3b6   : > { %v1685_v9 = vadd.f32 %v1684_v36, %v1683_v61  ;;  %v1680_v35 = vadd.f32 %v1679_v32, %v1678_v48  ;;  %v3435_v17 = vadd.f32 %v1046_v0, %v1045_v60  ;;  %v1708_v25 = vmul.f32 1.442695, %v3433_v40 }
 0x3b7   : > { %2542 = vpow2.f32 %v1073_v31  ;;  %vm1691_vm14 = vcmp.gt.f32.partialorder %v3368_v38, 0.0  ;;  %v2316_v2 = vadd.f32 -1.0, %v2529_v24  ;;  %v1088_v23 = vsel %vm1056_vm9, %v3366_v56, %v2288_v3  ;;  %v1826_v3 = vld [vmem:[%s3697_s7 + $0x8] sm:$0xff] }
 0x3b8   : > { %v1681_v57 = vrot.slane %v1680_v35, 1  ;;  %v1686_v41 = vrot.slane %v1685_v9, 2  ;;  %2544 = vpow2.f32 %v1704_v53  ;;  %v1075_v33 = vmul.f32 1.442695, %v3435_v17 }
 0x3b9   : > { %2546 = vpow2.f32 %v1706_v11  ;;  %v2535_v49 = vpop.eup %2534  ;;  %vm1690_vm0 = vcmp.gt.f32.partialorder %v3372_v37, 0.0  ;;  %vm1111_vm15 = vcmask 523520   ;;  %v1087_v46 = vsel %vm1055_vm11, %v3360_v44, %v2287_v55 }
 0x3ba   : > { %v3439_v42 = vadd.f32 %v1681_v57, %v1680_v35  ;;  %v1687_v62 = vadd.f32 %v1686_v41, %v1685_v9  ;;  %2548 = vpow2.f32 %v1708_v25  ;;  %v2537_v52 = vpop.eup %2536  ;;  %v2290_v8 = vadd.f32 -1.0, %v2535_v49  ;;  %v1825_v49 = vld [vmem:[%s3697_s7] sm:$0xff] }
 0x3bb   : > { %2550 = vpow2.f32 %v1075_v33  ;;  %v2539_v50 = vpop.eup %2538  ;;  %v2291_v10 = vadd.f32 -1.0, %v2537_v52  ;;  %v2315_v16 = vadd.f32 -1.0, %v3418_v29  ;;  %vm1057_vm10 = vcmp.gt.f32.partialorder %v3383_v13, 0.0 }
 0x3bc   : > { %v1710_v47 = vmul.f32 1.442695, %v3439_v42  ;;  %v1688_v51 = vrot.slane %v1687_v62, 1  ;;  %v2541_v26 = vpop.eup %2540  ;;  %vm1692_vm12 = vcmp.gt.f32.partialorder %v3393_v54, 0.0  ;;  %v1089_v6 = vsel %vm1057_vm10, %v3383_v13, %v2289_v12  ;;  %v1828_v12 = vld [vmem:[%s3697_s7 + $0x18] sm:$0xff] }
 0x3bd   : > { %vm1058_vm13 = vcmp.gt.f32.partialorder %v3404_v43, 0.0  ;;  %v1103_v14 = vsel %vm571_vm1, %v1088_v23, %v1087_v46  ;;  %v1723_v44 = vsel %vm1691_vm14, %v3368_v38, %v2316_v2  ;;  %vm1059_vm11 = vcmp.gt.f32.partialorder %v3406_v20, 0.0 }
 0x3be   : > { %2552 = vpow2.f32 %v1710_v47  ;;  %v3443_v45 = vadd.f32 %v1688_v51, %v1687_v62  ;;  %v1090_v29 = vsel %vm1058_vm13, %v3404_v43, %v2290_v8  ;;  %v2317_v19 = vadd.f32 -1.0, %v2539_v50  ;;  %v1827_v51 = vld [vmem:[%s3697_s7 + $0x10] sm:$0xff]  ;;  %v2323_v50 = vld [vmem:[%s3724_s6] ss:$0 sm:$0xff] }
 0x3bf   : > { %vm1062_vm9 = vcmp.gt.f32.partialorder %v3414_v22, 0.0  ;;  %v1091_v13 = vsel %vm1059_vm11, %v3406_v20, %v2291_v10  ;;  %vm1060_vm10 = vcmp.gt.f32.partialorder %v3428_v15, 0.0  ;;  %v1104_v5 = vsel %vm573_vm2, %v1089_v6, %v1103_v14 }
 0x3c0   : > { %v1712_v4 = vmul.f32 1.442695, %v3443_v45  ;;  %v2294_v48 = vadd.f32 -1.0, %v2541_v26  ;;  %v1722_v38 = vsel %vm1690_vm0, %v3372_v37, %v2315_v16  ;;  %v1105_v43 = vsel %vm575_vm3, %v1090_v29, %v1104_v5 }
 0x3c1   : > { %v2543_v27 = vpop.eup %2542  ;;  %vm1693_vm14 = vcmp.gt.f32.partialorder %v3421_v58, 0.0  ;;  %v1106_v20 = vsel %vm577_vm4, %v1091_v13, %v1105_v43  ;;  %vm1061_vm13 = vcmp.gt.f32.partialorder %v3435_v17, 0.0  ;;  %v1724_v32 = vsel %vm1692_vm12, %v3393_v54, %v2317_v19  ;;  %v2007_v43 = vld [vmem:[%s3698_s8 + $0x8] sm:$0xff] }
 0x3c2   : > { %v2545_v24 = vpop.eup %2544  ;;  %v2292_v56 = vadd.f32 -1.0, %v2543_v27  ;;  %2554 = vpow2.f32 %v1712_v4  ;;  %v1094_v53 = vsel %vm1062_vm9, %v3414_v22, %v2294_v48  ;;  %vm1694_vm0 = vcmp.gt.f32.partialorder %v3426_v30, 0.0 }
 0x3c3   : > { %v2547_v18 = vpop.eup %2546  ;;  %v2318_v61 = vadd.f32 -1.0, %v2545_v24  ;;  %v1738_v35 = vsel %vm571_vm1, %v1723_v44, %v1722_v38  ;;  %vm1695_vm12 = vcmp.gt.f32.partialorder %v3433_v40, 0.0  ;;  %vm1696_vm11 = vcmp.gt.f32.partialorder %v3439_v42, 0.0  ;;  %v2006_v38 = vld [vmem:[%s3698_s8] sm:$0xff] }
 0x3c4   : > { %v2549_v63 = vpop.eup %2548  ;;  %v1092_v7 = vsel %vm1060_vm10, %v3428_v15, %v2292_v56  ;;  %v2319_v1 = vadd.f32 -1.0, %v2547_v18  ;;  %v1739_v31 = vsel %vm573_vm2, %v1724_v32, %v1738_v35  ;;  %vm1697_vm1 = vcmp.gt.f32.partialorder %v3443_v45, 0.0  ;;  %v2011_v32 = vld [vmem:[%s3698_s8 + $0x28] sm:$0xff] }
 0x3c5   : > { %v2551_v21 = vpop.eup %2550  ;;  %v2320_v60 = vadd.f32 -1.0, %v2549_v63  ;;  %v1107_v15 = vsel %vm579_vm6, %v1092_v7, %v1106_v20  ;;  %v1725_v34 = vsel %vm1693_vm14, %v3421_v58, %v2318_v61  ;;  %vm1769_vm2 = vcmask 523264  }
 0x3c6   : > { %v2293_v36 = vadd.f32 -1.0, %v2551_v21  ;;  %v1726_v11 = vsel %vm1694_vm0, %v3426_v30, %v2319_v1  ;;  %v1740_v58 = vsel %vm575_vm3, %v1725_v34, %v1739_v31  ;;  %vm3723_vm3 = vmmov 0   ;;  %v2008_v1 = vld [vmem:[%s3698_s8 + $0x10] sm:$0xff] }
 0x3c7   : > { %v1727_v39 = vsel %vm1695_vm12, %v3433_v40, %v2320_v60  ;;  %v1741_v57 = vsel %vm577_vm4, %v1726_v11, %v1740_v58  ;;  %v2710_v52 = vmov 0.0|0.0   ;;  %v2406_v55 = vpack.c.bf16 %v1826_v3, %v1825_v49  ;;  %v2010_v60 = vld [vmem:[%s3698_s8 + $0x20] sm:$0xff] }
 0x3c8   : > { %v2553_v28 = vpop.eup %2552  ;;  %v1093_v37 = vsel %vm1061_vm13, %v3435_v17, %v2293_v36  ;;  %v1742_v41 = vsel %vm579_vm6, %v1727_v39, %v1741_v57  ;;  %2405 = vmatprep.subr.bf16.mxu0 %v2710_v52  ;;  %2411 = vmatprep.subr.bf16.mxu1 %v2710_v52  ;;  %v2014_v36 = vpack.c.bf16 %v2007_v43, %v2006_v38  ;;  %vm2071_vm4 = vcmask 0  }
 0x3c9   : > { %v2321_v9 = vadd.f32 -1.0, %v2553_v28  ;;  %v1108_v0 = vsel %vm581_vm7, %v1093_v37, %v1107_v15  ;;  %2407 = vmatpush3.bf16.msra.mxu0 %v2406_v55  ;;  %v2009_v28 = vld [vmem:[%s3698_s8 + $0x18] sm:$0xff]  ;;  %v2016_v15 = vpack.c.bf16 %v2011_v32, %v2010_v60  ;;  %v2012_v37 = vld [vmem:[%s3698_s8 + $0x30] sm:$0xff] }
 0x3ca   : > { %v1109_v54 = vsel %vm583_vm8, %v1094_v53, %v1108_v0  ;;  %2408 = vmatprep.subr.bf16.mxu0 %v2710_v52  ;;  %v2015_v20 = vpack.c.bf16 %v2009_v28, %v2008_v1 }
 0x3cb   : > { %1112 = vst.msk [vmem:[#allocation2] sm:$0xff] %vm1111_vm15, %v1109_v54  ;;  %v1728_v17 = vsel %vm1696_vm11, %v3439_v42, %v2321_v9  ;;  %v2013_v9 = vld [vmem:[%s3698_s8 + $0x38] sm:$0xff] }
 0x3cc   : > { %v2555_v22 = vpop.eup %2554  ;;  %v1743_v25 = vsel %vm581_vm7, %v1728_v17, %v1742_v41  ;;  %v2017_v53 = vpack.c.bf16 %v2013_v9, %v2012_v37 }
 0x3cd   : > { %v2322_v30 = vadd.f32 -1.0, %v2555_v22 }
 0x3cf   : > { %v1729_v40 = vsel %vm1697_vm1, %v3443_v45, %v2322_v30  ;;  %v2409_v45 = vpack.c.bf16 %v1828_v12, %v1827_v51 }
 0x3d0   : > { %v1744_v33 = vsel %vm583_vm8, %v1729_v40, %v1743_v25 }
 0x3d1   : > { %1746 = vst.msk [vmem:[#allocation2 + $0x8] sm:$0xff] %vm1111_vm15, %v1744_v33  ;;  %2410 = vmatpush3.bf16.msra.mxu0 %v2409_v45 }
 0x3d2   : > { %v3502_v62 = vld [vmem:[#allocation2] sm:$0xff]  ;;  %2393 = vmatprep.subr.bf16.mxu0 %v2708_v59 }
 0x3d8   : > { %v3504_v47 = vld [vmem:[#allocation2 + $0x8] sm:$0xff] }
 0x3d9   : > { %v1749_v42 = vpack.c.bf16 %v3504_v47, %v3502_v62 }
 0x3db   : > { %2368 = vmatmul.mubr.msk.bf16.vlgmr.msra.gmra.mrb[0].mxu1 %vm1769_vm2, %v1749_v42 }
 0x3dc   : > { %2390 = vmatprep.mubr.msk.f32.mxu1 %vm3723_vm3, %v2708_v59  ;;  %2413 = vmatpush3.bf16.msra.mxu1 %v2406_v55 }
 0x3dd   : > { %2414 = vmatprep.subr.bf16.mxu1 %v2710_v52 }
 0x3e0   : > { %2416 = vmatpush3.bf16.msra.mxu1 %v2409_v45 }
 0x4ae   : > { %v1807_v2 = vpop.f32.mrb[0].mxu1 }
 0x4af   : > { %v1808_v8 = vadd.f32 %v2323_v50, %v1807_v2  ;;  %v2369_v26 = vpop.f32.mrb[1].mxu1 }
 0x4b0   : > { %v1810_v23 = vpop.f32.mrb[2].mxu1 }
 0x4b1   : > { %2556 = vtanh.f32 %v1808_v8  ;;  %v1811_v10 = vadd.f32 %v2323_v50, %v1810_v23  ;;  %v2370_v4 = vpop.f32.mrb[3].mxu1 }
 0x4b3   : > { %2558 = vtanh.f32 %v1811_v10 }
 0x4bb   : > { %v2557_v27 = vpop.eup %2556 }
 0x4bc   : > { %v1816_v46 = vsel %vm488_vm5, %v2557_v27, 0.0 }
 0x4bd   : > { %v2559_v16 = vpop.eup %2558  ;;  %v1817_v24 = vrot.slane %v1816_v46, 4 }
 0x4be   : > { %v1902_v6 = vsel %vm488_vm5, %v2559_v16, 0.0 }
 0x4bf   : > { %v1903_v56 = vrot.slane %v1902_v6, 4  ;;  %v1818_v18 = vadd.f32 %v1817_v24, %v1816_v46 }
 0x4c1   : > { %v1904_v14 = vadd.f32 %v1903_v56, %v1902_v6  ;;  %v1819_v44 = vrot.slane %v1818_v18, 2 }
 0x4c3   : > { %v1905_v29 = vrot.slane %v1904_v14, 2  ;;  %v1820_v63 = vadd.f32 %v1819_v44, %v1818_v18 }
 0x4c5   : > { %v1821_v19 = vrot.slane %v1820_v63, 1  ;;  %v1906_v13 = vadd.f32 %v1905_v29, %v1904_v14 }
 0x4c7   : > { %v1822_v21 = vadd.f32 %v1821_v19, %v1820_v63  ;;  %v1907_v5 = vrot.slane %v1906_v13, 1 }
 0x4c9   : > { %v1824_v48 = vmul.f32 0.125, %v1822_v21  ;;  %v1908_v61 = vadd.f32 %v1907_v5, %v1906_v13 }
 0x4cb   : > { %2380 = vmatmul.mubr.msk.f32.vlgmr.msra.gmra.mrb[0].mxu0 %vm488_vm5, %v1824_v48  ;;  %v1909_v7 = vmul.f32 0.125, %v1908_v61 }
 0x4cc   : > { %2401 = vmatprep.mubr.msk.bf16.mxu0 %vm3723_vm3, %v2708_v59  ;;  %2394 = vmatpush3.bf16.msra.mxu0 %v2014_v36 }
 0x4cd   : > { %2391 = vmatmul.mubr.msk.f32.vlgmr.msra.gmra.mrb[4].mxu1 %vm488_vm5, %v1909_v7  ;;  %2395 = vmatprep.subr.bf16.mxu0 %v2708_v59  ;;  %vm2076_vm5 = vcmask 8200  }
 0x4d0   : > { %2396 = vmatpush3.bf16.msra.mxu0 %v2015_v20 }
 0x4d1   : > { %2397 = vmatprep.subr.bf16.mxu0 %v2708_v59 }
 0x4d4   : > { %2398 = vmatpush3.bf16.msra.mxu0 %v2016_v15 }
 0x4d5   : > { %2399 = vmatprep.subr.bf16.mxu0 %v2708_v59 }
 0x4d8   : > { %2400 = vmatpush3.bf16.msra.mxu0 %v2017_v53 }
 0x59e   : > { %v1898_v34 = vpop.f32.mrb[0].mxu0 }
 0x59f   : > { %v2381_v0 = vpop.f32.mrb[1].mxu0 }
 0x5a0   : > { %v1979_v35 = vpop.f32.mrb[4].mxu1 }
 0x5a1   : > { %v1983_v11 = vmax.f32 %v1898_v34, %v1979_v35  ;;  %v2392_v54 = vpop.f32.mrb[5].mxu1 }
 0x5a3   : > { %v1984_v31 = vsub.f32 %v1898_v34, %v1983_v11  ;;  %v1987_v39 = vsub.f32 %v1979_v35, %v1983_v11 }
 0x5a5   : > { %v1985_v22 = vmul.f32 1.442695, %v1984_v31  ;;  %v1988_v59 = vmul.f32 1.442695, %v1987_v39 }
 0x5a7   : > { %2560 = vpow2.f32 %v1985_v22 }
 0x5a8   : > { %2562 = vpow2.f32 %v1988_v59 }
 0x5b1   : > { %v2561_v58 = vpop.eup %2560 }
 0x5b2   : > { %v2563_v17 = vpop.eup %2562 }
 0x5b3   : > { %v1990_v57 = vadd.f32 %v2563_v17, %v2561_v58 }
 0x5b5   : > { %2564 = vrcp.f32 %v1990_v57 }
 0x5bf   : > { %v2565_v30 = vpop.eup %2564 }
 0x5c0   : > { %v1993_v41 = vmul.f32 %v2565_v30, %v2563_v17  ;;  %v1992_v25 = vmul.f32 %v2565_v30, %v2561_v58 }
 0x5c2   : > { %2073 = vrot.lane.b32.xlu0 %v1993_v41, %s2711_s20  ;;  %2417 = vpush %v1992_v25 }
 0x5c3   : > { %2072 = vst.msk [vmem:[%s3564_s16] sm:$0x1] %vm2071_vm4, %v1992_v25 }
 0x5c4   : > { %2419 = vpush %v1993_v41 }
 0x5f3   : > { %s2418_s26 = spop %2417 }
 0x5f4   : > { %v1996_v40 = vstv %s2418_s26  ;;  %s3581_s26 = scalar_lea.hbm %s3700_s10, %s3707_s19 }
 0x5f5   : > { %s2420_s28 = spop %2419  ;;  %v1998_v33 = vmul.f32 %v1996_v40, %v3502_v62 }
 0x5f6   : > { %v2001_v42 = vstv %s2420_s28  ;;  %s2101_s28 = sshll.u32 %s440_s18, 4  ;;  %s2102_s28 = int_to_ptr.vmem [resolvable:$true] %s2101_s28 }
 0x5f7   : > { %v2003_v49 = vmul.f32 %v2001_v42, %v3504_v47  ;;  %s2582_s1 = scalar_lea.vmem %s2102_s28, 128  ;;  %p2589_p0 = scmp.lt.s32.totalorder %s2102_s28, %s2587_s2 }
 0x5f8   : > { %p2583_p11 = scmp.ne.s32.totalorder %s2102_s28, %s2582_s1  ;;  %p2590_p1 = scmp.lt.s32.totalorder %s2588_s3, %s2582_s1 }
 0x5f9   : > { %v2004_v3 = vadd.f32 %v2003_v49, %v1998_v33 }
 0x5fa   : > { %p2584_p12 = pnand %p2583_p11, %p2820_p5  ;;  %p2591_p2 = por %p2590_p1, %p2589_p0 }
 0x5fb   : > { %v2005_v51 = vpack.c.bf16 %v2004_v3, %v2004_v3  ;;  %2068 = vst.msk [vmem:[%s440_s18] sm:$0xff] %vm1769_vm2, %v2004_v3 }
 0x5fc   : > { %p2585_p13 = pneg %p2584_p12 }
 0x5fd   : > { %2402 = vmatmul.mubr.msk.bf16.vlgmr.msra.gmra.mrb[4].mxu0 %vm1769_vm2, %v2005_v51 }
 0x5fe   : > { %p2592_p3 = pnand %p2591_p2, %p2585_p13 }
 0x634   : > { %v2074_v52 = vpop.permute.xlu0 %2073 }
 0x635   : > { %2077 = vst.msk [vmem:[%s3564_s16] sm:$0x1] %vm2076_vm5, %v2074_v52 }
 0x636   : > { %2595 = shalt.err (!%p2592_p3)
}
 0x637   : > { %s2596_s18 = scalar_lea.hbm %s3581_s26, 128  ;;  %s2600_s17 = scalar_lea.hbm %s3700_s10, 256 }
 0x638   : > { %p2597_p4 = scmp.ne.s32.totalorder %s3581_s26, %s2596_s18  ;;  %p2601_p9 = scmp.lt.u32.totalorder %s3581_s26, %s3700_s10 }
 0x639   : > { %p2602_p10 = scmp.lt.u32.totalorder %s2600_s17, %s2596_s18  ;;  %p2604_p12 = scmp.lt.u32.totalorder %s2596_s18, %s3581_s26 }
 0x63a   : > { %p2598_p7 = pnand %p2597_p4, %p2820_p5 }
 0x63b   : > { %p2603_p11 = por %p2602_p10, %p2601_p9 }
 0x63c   : > { %p2599_p8 = pneg %p2598_p7 }
 0x63d   : > { %p2605_p13 = por %p2604_p12, %p2603_p11 }
 0x63f   : > { %p2606_p0 = pnand %p2605_p13, %p2599_p8 }
 0x641   : > { %2609 = shalt.err (!%p2606_p0)
}
 0x642   : > { %2421 = dma.vmem_to_hbm [thread:$0]  (%p2820_p5), %s2102_s28, 128, %s3581_s26, %s2079_s0   ;;  %v2327_v62 = vld [vmem:[%s3699_s9] ss:$0 sm:$0xff]  ;;  %vm2069_vm6 = vcmask 130048  }
 0x643   : > { %s2083_s1 = sand.u32 1, %s2801_s25   ;;  %s3725_s19 = sshll.u32 %s3561_s15, 3 }
 0x644   : > { %s447_s20 = scalar_lea.vmem [#allocation5], %s3725_s19  ;;  %s2333_s17 = sshll.u32 %s2801_s25, 4 }
 0x645   : > { %s2114_s18 = sshll.u32 %s447_s20, 4  ;;  %s2127_s2 = sshll.u32 %s3564_s16, 4  ;;  %s3616_s18 = int_to_ptr.vmem [resolvable:$true] %s2114_s18  ;;  %s3623_s2 = int_to_ptr.vmem [resolvable:$true] %s2127_s2 }
 0x646   : > { %s3726_s4 = sshll.u32 %s2801_s25, 7  ;;  %s3621_s16 = scalar_lea.hbm %s3702_s12, %s2333_s17 }
 0x647   : > { %s3614_s0 = scalar_lea.hbm %s3701_s11, %s3726_s4  ;;  %s3625_s25 = scalar_lea.sflag [#allocation6], %s2083_s1 }
 0x648   : > { %s2610_s5 = scalar_lea.vmem %s3616_s18, 128  ;;  %s2713_s4 = smov [#allocation5]  }
 0x649   : > { %p2611_p1 = scmp.ne.s32.totalorder %s3616_s18, %s2610_s5  ;;  %s2614_s6 = sshll.u32 %s2713_s4, 4  ;;  %s2615_s6 = int_to_ptr.vmem [resolvable:$false] %s2614_s6 }
 0x64a   : > { %s2616_s28 = scalar_lea.vmem %s2615_s6, 256  ;;  %p2617_p4 = scmp.lt.s32.totalorder %s3616_s18, %s2615_s6 }
 0x64b   : > { %p2612_p2 = pnand %p2611_p1, %p2820_p5  ;;  %p2618_p7 = scmp.lt.s32.totalorder %s2616_s28, %s2610_s5 }
 0x64d   : > { %p2613_p3 = pneg %p2612_p2  ;;  %p2619_p8 = por %p2618_p7, %p2617_p4 }
 0x64f   : > { %p2620_p9 = pnand %p2619_p8, %p2613_p3 }
 0x6d0   : > { %v2062_v47 = vpop.f32.mrb[4].mxu0 }
 0x6d1   : > { %v2063_v55 = vadd.f32 %v2327_v62, %v2062_v47  ;;  %v2403_v12 = vpop.f32.mrb[5].mxu0 }
 0x6d2   : > { %v2065_v45 = vpop.f32.mrb[6].mxu0 }
 0x6d3   : > { %v2404_v50 = vpop.f32.mrb[7].mxu0  ;;  %2070 = vst.msk [vmem:[%s447_s20] sm:$0xff] %vm2069_vm6, %v2063_v55 }
 0x6d4   : > { %2623 = shalt.err (!%p2620_p9)
}
 0x6d5   : > { %s2624_s1 = scalar_lea.hbm %s3614_s0, 128  ;;  %s2628_s19 = scalar_lea.hbm %s3701_s11, 256 }
 0x6d6   : > { %p2625_p10 = scmp.ne.s32.totalorder %s3614_s0, %s2624_s1  ;;  %p2629_p13 = scmp.lt.u32.totalorder %s3614_s0, %s3701_s11 }
 0x6d7   : > { %p2630_p0 = scmp.lt.u32.totalorder %s2628_s19, %s2624_s1  ;;  %p2632_p2 = scmp.lt.u32.totalorder %s2624_s1, %s3614_s0 }
 0x6d8   : > { %p2626_p11 = pnand %p2625_p10, %p2820_p5 }
 0x6d9   : > { %p2631_p1 = por %p2630_p0, %p2629_p13 }
 0x6da   : > { %p2627_p12 = pneg %p2626_p11 }
 0x6db   : > { %p2633_p3 = por %p2632_p2, %p2631_p1 }
 0x6dd   : > { %p2634_p4 = pnand %p2633_p3, %p2627_p12 }
 0x6df   : > { %2637 = shalt.err (!%p2634_p4)
}
 0x6e0   : > { %2422 = dma.vmem_to_hbm [thread:$0]  (%p2820_p5), %s3616_s18, 128, %s3614_s0, %s3625_s25  }
 0x6e1   : > { %s2638_s15 = scalar_lea.vmem %s3623_s2, 16  ;;  %s2714_s26 = smov [#allocation7]  }
 0x6e2   : > { %p2639_p7 = scmp.ne.s32.totalorder %s3623_s2, %s2638_s15  ;;  %s2642_s5 = sshll.u32 %s2714_s26, 4  ;;  %s2643_s5 = int_to_ptr.vmem [resolvable:$false] %s2642_s5 }
 0x6e3   : > { %s2644_s4 = scalar_lea.vmem %s2643_s5, 32  ;;  %p2645_p10 = scmp.lt.s32.totalorder %s3623_s2, %s2643_s5 }
 0x6e4   : > { %p2640_p8 = pnand %p2639_p7, %p2820_p5  ;;  %p2646_p11 = scmp.lt.s32.totalorder %s2644_s4, %s2638_s15 }
 0x6e6   : > { %p2641_p9 = pneg %p2640_p8  ;;  %p2647_p12 = por %p2646_p11, %p2645_p10 }
 0x6e8   : > { %p2648_p13 = pnand %p2647_p12, %p2641_p9 }
 0x6ea   : > { %2651 = shalt.err (!%p2648_p13)
}
 0x6eb   : > { %s2652_s18 = scalar_lea.hbm %s3621_s16, 16  ;;  %s2656_s28 = scalar_lea.hbm %s3702_s12, 32 }
 0x6ec   : > { %p2653_p0 = scmp.ne.s32.totalorder %s3621_s16, %s2652_s18  ;;  %p2657_p3 = scmp.lt.u32.totalorder %s3621_s16, %s3702_s12 }
 0x6ed   : > { %p2658_p4 = scmp.lt.u32.totalorder %s2656_s28, %s2652_s18  ;;  %p2660_p8 = scmp.lt.u32.totalorder %s2652_s18, %s3621_s16 }
 0x6ee   : > { %p2654_p1 = pnand %p2653_p0, %p2820_p5 }
 0x6ef   : > { %p2659_p7 = por %p2658_p4, %p2657_p3 }
 0x6f0   : > { %p2655_p2 = pneg %p2654_p1 }
 0x6f1   : > { %p2661_p9 = por %p2660_p8, %p2659_p7 }
 0x6f3   : > { %p2662_p10 = pnand %p2661_p9, %p2655_p2 }
 0x6f5   : > { %2665 = shalt.err (!%p2662_p10)
}
 0x6f6   : > { %2423 = dma.vmem_to_hbm [thread:$0]  (%p2820_p5), %s3623_s2, 16, %s3621_s16, %s3625_s25  }
 0x6f7 PF: > { %p2437_p11 = scmp.ge.s32.totalorder %s2704_s24, 2  ;;  %s2139_s29 = sand.u32 1, %s2692_s21  }
 0x6f8   : > { %s2140_s19 = scalar_lea.sflag [#allocation4], %s2139_s29 }
 0x6f9   : > { %p2428_p12 = pnand %p2437_p11, %p2824_p6 }
 0x6fb   : > { %2683 = dma.done.wait (!%p2428_p12), %s2140_s19, 128  }
 0x6fc   : > { %2685 = vsyncadd (!%p2428_p12), %s2140_s19, 4294967168  ;;  %s3727_s20 = sadd.s32 4294967294, %s2704_s24  }
 0x6fd   : > { %s2148_s17 = sand.u32 1, %s3727_s20  }
 0x6fe   : > { %s2149_s15 = scalar_lea.sflag [#allocation6], %s2148_s17 }
 0x6ff   : > { %2687 = dma.done.wait (!%p2428_p12), %s2149_s15, 144  }
 0x700   : > { %2689 = vsyncadd (!%p2428_p12), %s2149_s15, 4294967152  ;;  %p26_p5 = scmp.ge.s32.totalorder %s2805_s27, 4   ;;  %s3728_s21 = smov %s2696_s22 }
 0x701   : > { %s3729_s22 = smov %s2700_s23  ;;  %s3730_s23 = smov %s2818_s30 }
 0x702   : > { %s3731_s24 = smov %s2805_s27  ;;  %28 = sbr.rel (!%p26_p5) target bundleno = 13 (0xd), region = 138 }
 0x709   :  { %2162 = vsyncpa [#allocation4], 1 }
 0x70a   :  { %2164 = vsyncpa [#allocation4 + $0x1], 1 }
 0x70b   :  { %2165 = vsyncpa [#allocation6], 1 }
 0x70c   :  { %2167 = vsyncpa [#allocation6 + $0x1], 1 }

</bundles_post_ra>
